<compile_context>
chip_gen: v7x
topology: tpu7x:2x2x1
jax: 0.10.0
libtpu: 0.0.40
codegen_flags: <defaults>
</compile_context>

<pallas_src>
import functools

import jax
import jax.numpy as jnp
from jax import lax
from jax.experimental import pallas as pl
from jax.experimental.pallas import tpu as pltpu

F_IN = 768
H1 = 128   # GRU_HIDDEN_SIZE_1
H2 = 64    # GRU_HIDDEN_SIZE_2
H3 = 16    # GRU_HIDDEN_SIZE_3


def _round_up(x, m):
    return (x + m - 1) // m * m


def sentiment_kernel(x_ref,                  # (TILE_T*B_pad, 768)  current time tile (flattened)
                     wih_ref,                # (768, 3*128)  = W_ih_reverse^T  (resident)
                     whh_ref,                # (128, 3*128)  = W_hh_reverse^T  (resident)
                     bih_ref, bhh_ref,       # (1, 3*128) each
                     w1_ref, b1_ref,         # (128, 64), (1, 64)
                     w2_ref, b2_ref,         # (64, 16),  (1, 16)
                     w3_ref, b3_ref,         # (16, 1),   (1, 1)
                     out_ref,                # (B_pad, 1)
                     gi_ref,                 # VMEM (TILE_T*B_pad, 3*128) scratch
                     h_ref,                  # VMEM (B_pad, 128) scratch (carried across grid)
                     *, tile_t, b_pad, t_actual):
    H = H1
    i = pl.program_id(0)
    nt = pl.num_programs(0)

    # h0 = zeros (PyTorch default), once at the first grid step.
    @pl.when(i == 0)
    def _():
        h_ref[...] = jnp.zeros_like(h_ref)

    # ---- Hoisted input projection: one big MXU matmul per tile -------------
    # Fold b_ih fully and the r/z part of b_hh into the projection bias.
    # (b_hn stays separate: it sits inside r * (gh_n + b_hn) in the n-gate.)
    lane = lax.broadcasted_iota(jnp.int32, (1, 3 * H), 1)
    bias_proj = bih_ref[...] + jnp.where(lane < 2 * H, bhh_ref[...], 0.0)
    gi_ref[...] = jnp.dot(x_ref[...], wih_ref[...],
                          preferred_element_type=jnp.float32) + bias_proj

    # Hoisted loop-invariant broadcast of b_hn to (B_pad, H).
    b_hn = jnp.broadcast_to(bhh_ref[:, 2 * H:3 * H], (b_pad, H))

    # This tile covers global timesteps [tile_base, tile_base + tile_t).
    tile_base = (nt - 1 - i) * tile_t

    def step(k, h):
        # Reverse traversal inside the tile: local_t = tile_t-1, ..., 0.
        local_t = tile_t - 1 - k
        row = pl.multiple_of(local_t * b_pad, b_pad)
        g = gi_ref[pl.ds(row, b_pad), :]                       # (B_pad, 3H)
        gh = jnp.dot(h, whh_ref[...], preferred_element_type=jnp.float32)
        rz = jax.nn.sigmoid(g[:, :2 * H] + gh[:, :2 * H])      # b_hh[rz] already folded
        r = rz[:, :H]
        z = rz[:, H:]
        n = jnp.tanh(g[:, 2 * H:] + r * (gh[:, 2 * H:] + b_hn))
        h_new = (1.0 - z) * n + z * h
        # Padded timesteps (t >= t_actual) are processed first in reverse order
        # and must leave h untouched.
        return jnp.where(tile_base + local_t < t_actual, h_new, h)

    h_ref[...] = lax.fori_loop(0, tile_t, step, h_ref[...])

    # ---- Tiny MLP head: only on the last grid step --------------------------
    @pl.when(i == nt - 1)
    def _():
        e = h_ref[...]                                                   # (B_pad, 128)
        o = jnp.dot(e, w1_ref[...], preferred_element_type=jnp.float32) + b1_ref[...]
        o = jnp.maximum(o, 0.0)
        o = jnp.dot(o, w2_ref[...], preferred_element_type=jnp.float32) + b2_ref[...]
        o = jnp.maximum(o, 0.0)
        o = jnp.dot(o, w3_ref[...], preferred_element_type=jnp.float32) + b3_ref[...]
        out_ref[...] = jax.nn.sigmoid(o) * 10.0


@functools.partial(jax.jit, static_argnames=("tile_t",))
def sentiment_forward(x, params, tile_t=16):
    T, B, F = x.shape
    assert F == F_IN
    b_pad = _round_up(max(B, 8), 8)            # fill f32 sublanes / MXU rows
    t_pad = _round_up(T, tile_t)
    nt = t_pad // tile_t

    # Pad batch + time (padded timesteps/rows are masked / sliced away) and
    # flatten (T, B, F) -> (T*B, F) so the per-tile input projection is one
    # lane/sublane-dense matmul with T folded into the batch dimension.
    x_p = jnp.pad(x.astype(jnp.float32),
                  ((0, t_pad - T), (0, b_pad - B), (0, 0)))
    x2d = x_p.reshape(t_pad * b_pad, F_IN)

    (w_ih_t, w_hh_t, b_ih, b_hh,
     w1, b1, w2, b2, w3, b3) = params

    kernel = functools.partial(sentiment_kernel,
                               tile_t=tile_t, b_pad=b_pad, t_actual=T)

    const = lambda shape: pl.BlockSpec(shape, lambda i: (0,) * len(shape))

    flops = (2 * t_pad * b_pad * F_IN * 3 * H1          # input projection
             + 2 * t_pad * b_pad * H1 * 3 * H1          # recurrent matmul
             + 2 * b_pad * (H1 * H2 + H2 * H3 + H3))    # MLP head
    bytes_accessed = 4 * (x2d.size + w_ih_t.size + w_hh_t.size
                          + b_ih.size + b_hh.size
                          + w1.size + b1.size + w2.size + b2.size
                          + w3.size + b3.size + b_pad)
    transcendentals = 3 * t_pad * b_pad * H1 + b_pad

    out_full = pl.pallas_call(
        kernel,
        out_shape=jax.ShapeDtypeStruct((b_pad, 1), jnp.float32),
        grid_spec=pltpu.PrefetchScalarGridSpec(
            num_scalar_prefetch=0,
            grid=(nt,),
            in_specs=[
                # x: streamed one reverse-ordered time tile per grid step.
                pl.BlockSpec((tile_t * b_pad, F_IN), lambda i: (nt - 1 - i, 0)),
                const((F_IN, 3 * H1)),      # W_ih^T   (resident)
                const((H1, 3 * H1)),        # W_hh^T   (resident)
                const((1, 3 * H1)),         # b_ih
                const((1, 3 * H1)),         # b_hh
                const((H1, H2)), const((1, H2)),
                const((H2, H3)), const((1, H3)),
                const((H3, 1)),  const((1, 1)),
            ],
            out_specs=pl.BlockSpec((b_pad, 1), lambda i: (0, 0)),
            scratch_shapes=[
                pltpu.VMEM((tile_t * b_pad, 3 * H1), jnp.float32),  # gi tile
                pltpu.VMEM((b_pad, H1), jnp.float32),               # h carry
            ]),
        compiler_params=pltpu.CompilerParams(
            dimension_semantics=("arbitrary",),        # sequential recurrence
            vmem_limit_bytes=32 * 1024 * 1024),
        cost_estimate=pl.CostEstimate(flops=flops,
                                      transcendentals=transcendentals,
                                      bytes_accessed=bytes_accessed),
    )(x2d, w_ih_t, w_hh_t, b_ih, b_hh, w1, b1, w2, b2, w3, b3)

    return out_full[:B]


def init_params(key):
    """Deterministic synthetic weights, PyTorch-style uniform(-k, k) ranges."""
    ks = jax.random.split(key, 10)
    u = lambda k, shape, bound: jax.random.uniform(
        k, shape, jnp.float32, minval=-bound, maxval=bound)

    k_gru = 1.0 / jnp.sqrt(H1)
    # Reverse-direction GRU weights (the only ones hidden[-1] depends on),
    # stored pre-transposed for (rows, in) @ (in, 3H) matmuls.
    w_ih_t = u(ks[0], (F_IN, 3 * H1), k_gru)
    w_hh_t = u(ks[1], (H1, 3 * H1), k_gru)
    b_ih = u(ks[2], (1, 3 * H1), k_gru)
    b_hh = u(ks[3], (1, 3 * H1), k_gru)

    k1 = 1.0 / jnp.sqrt(H1)
    fc1_w_t = u(ks[4], (H1, H2), k1)
    fc1_b = u(ks[5], (1, H2), k1)
    k2 = 1.0 / jnp.sqrt(H2)
    fc2_w_t = u(ks[6], (H2, H3), k2)
    fc2_b = u(ks[7], (1, H3), k2)
    k3 = 1.0 / jnp.sqrt(H3)
    fc3_w_t = u(ks[8], (H3, 1), k3)
    fc3_b = u(ks[9], (1, 1), k3)

    return (w_ih_t, w_hh_t, b_ih, b_hh,
            fc1_w_t, fc1_b, fc2_w_t, fc2_b, fc3_w_t, fc3_b)


def reference_forward(x, params):
    """Pure-JAX reference mirroring PyTorch GRU (reverse dir) + MLP head."""
    w_ih_t, w_hh_t, b_ih, b_hh, w1, b1, w2, b2, w3, b3 = params
    T, B, _ = x.shape
    h = jnp.zeros((B, H1), jnp.float32)
    for i in range(T):
        t = T - 1 - i
        gi = x[t] @ w_ih_t + b_ih
        gh = h @ w_hh_t + b_hh
        r = jax.nn.sigmoid(gi[:, :H1] + gh[:, :H1])
        z = jax.nn.sigmoid(gi[:, H1:2 * H1] + gh[:, H1:2 * H1])
        n = jnp.tanh(gi[:, 2 * H1:] + r * gh[:, 2 * H1:])
        h = (1.0 - z) * n + z * h
    o = jnp.maximum(h @ w1 + b1, 0.0)
    o = jnp.maximum(o @ w2 + b2, 0.0)
    o = o @ w3 + b3
    return jax.nn.sigmoid(o) * 10.0


if __name__ == "__main__":
    key = jax.random.PRNGKey(0)
    k_x, k_x2, k_p = jax.random.split(key, 3)
    params = init_params(k_p)

    # Small test, matching the module's natural shapes (T, B, 768).
    T, B = 8, 2
    cls_vector = jax.random.normal(k_x, (T, B, F_IN), jnp.float32)
    out = jax.block_until_ready(sentiment_forward(cls_vector, params))
    ref = reference_forward(cls_vector, params)
    assert out.shape == (B, 1)
    assert jnp.allclose(out, ref, atol=1e-4, rtol=1e-4), (out, ref)

    # Second check exercising multi-tile grid + time/batch padding masks.
    T2, B2 = 37, 3
    cls_vector2 = jax.random.normal(k_x2, (T2, B2, F_IN), jnp.float32)
    out2 = jax.block_until_ready(sentiment_forward(cls_vector2, params))
    ref2 = reference_forward(cls_vector2, params)
    assert out2.shape == (B2, 1)
    assert jnp.allclose(out2, ref2, atol=1e-4, rtol=1e-4), (out2, ref2)

    print("KERNEL_OK")
</pallas_src>

<mosaic_0001>
module attributes {stable_mosaic.version = 11 : i64} {
  func.func @sentiment_kernel(%arg0: i32, %arg1: memref<128x768xf32, #tpu.memory_space<vmem>>, %arg2: memref<768x384xf32, #tpu.memory_space<vmem>>, %arg3: memref<128x384xf32, #tpu.memory_space<vmem>>, %arg4: memref<1x384xf32, #tpu.memory_space<vmem>>, %arg5: memref<1x384xf32, #tpu.memory_space<vmem>>, %arg6: memref<128x64xf32, #tpu.memory_space<vmem>>, %arg7: memref<1x64xf32, #tpu.memory_space<vmem>>, %arg8: memref<64x16xf32, #tpu.memory_space<vmem>>, %arg9: memref<1x16xf32, #tpu.memory_space<vmem>>, %arg10: memref<16x1xf32, #tpu.memory_space<vmem>>, %arg11: memref<1x1xf32, #tpu.memory_space<vmem>>, %arg12: memref<8x1xf32, #tpu.memory_space<vmem>>, %arg13: memref<128x384xf32, #tpu.memory_space<vmem>>, %arg14: memref<8x128xf32, #tpu.memory_space<vmem>>) attributes {dimension_semantics = [#tpu.dimension_semantics<arbitrary>], iteration_bounds = array<i64: 1>, scalar_prefetch = 0 : i64, scratch_operands = 2 : i64, tpu.core_type = #tpu.core_type<tc>, window_params = [{transform_indices = @transform_0, window_bounds = array<i64: 128, 768>}, {pipeline_mode = #tpu.pipeline_mode<synchronous>, transform_indices = @transform_1, window_bounds = array<i64: 768, 384>}, {pipeline_mode = #tpu.pipeline_mode<synchronous>, transform_indices = @transform_2, window_bounds = array<i64: 128, 384>}, {pipeline_mode = #tpu.pipeline_mode<synchronous>, transform_indices = @transform_3, window_bounds = array<i64: 1, 384>}, {pipeline_mode = #tpu.pipeline_mode<synchronous>, transform_indices = @transform_4, window_bounds = array<i64: 1, 384>}, {pipeline_mode = #tpu.pipeline_mode<synchronous>, transform_indices = @transform_5, window_bounds = array<i64: 128, 64>}, {pipeline_mode = #tpu.pipeline_mode<synchronous>, transform_indices = @transform_6, window_bounds = array<i64: 1, 64>}, {pipeline_mode = #tpu.pipeline_mode<synchronous>, transform_indices = @transform_7, window_bounds = array<i64: 64, 16>}, {pipeline_mode = #tpu.pipeline_mode<synchronous>, transform_indices = @transform_8, window_bounds = array<i64: 1, 16>}, {pipeline_mode = #tpu.pipeline_mode<synchronous>, transform_indices = @transform_9, window_bounds = array<i64: 16, 1>}, {pipeline_mode = #tpu.pipeline_mode<synchronous>, transform_indices = @transform_10, window_bounds = array<i64: 1, 1>}, {pipeline_mode = #tpu.pipeline_mode<synchronous>, transform_indices = @transform_11, window_bounds = array<i64: 8, 1>}]} {
    %c0_i32 = arith.constant 0 : i32
    %0 = arith.cmpi eq, %arg0, %c0_i32 : i32
    %1 = arith.extui %0 : i1 to i32
    %c0_i32_0 = arith.constant 0 : i32
    %2 = arith.cmpi ne, %1, %c0_i32_0 : i32
    scf.if %2 {
      %cst_22 = arith.constant 0.000000e+00 : f32
      %29 = vector.broadcast %cst_22 : f32 to vector<8x128xf32>
      %c0_23 = arith.constant 0 : index
      %c0_24 = arith.constant 0 : index
      %30 = vector.load %arg14[%c0_23, %c0_24] : memref<8x128xf32, #tpu.memory_space<vmem>>, vector<8x128xf32>
      tpu.vector_store %arg14[%c0_23, %c0_24], %29 {strides = array<i32>} : memref<8x128xf32, #tpu.memory_space<vmem>>, vector<8x128xf32>,
    } else {
    }
    %3 = tpu.iota {dimensions = array<i32: 1>} : vector<1x384xi32>
    %c0 = arith.constant 0 : index
    %c0_1 = arith.constant 0 : index
    %4 = vector.load %arg4[%c0, %c0_1] : memref<1x384xf32, #tpu.memory_space<vmem>>, vector<1x384xf32>
    %c256_i32 = arith.constant 256 : i32
    %5 = vector.broadcast %c256_i32 : i32 to vector<1x384xi32>
    %6 = arith.cmpi slt, %3, %5 : vector<1x384xi32>
    %c0_2 = arith.constant 0 : index
    %c0_3 = arith.constant 0 : index
    %7 = vector.load %arg5[%c0_2, %c0_3] : memref<1x384xf32, #tpu.memory_space<vmem>>, vector<1x384xf32>
    %cst = arith.constant 0.000000e+00 : f32
    %8 = vector.broadcast %cst : f32 to vector<1x384xf32>
    %9 = arith.select %6, %7, %8 : vector<1x384xi1>, vector<1x384xf32>
    %10 = arith.addf %4, %9 : vector<1x384xf32>
    %c0_4 = arith.constant 0 : index
    %c0_5 = arith.constant 0 : index
    %11 = vector.load %arg1[%c0_4, %c0_5] : memref<128x768xf32, #tpu.memory_space<vmem>>, vector<128x768xf32>
    %c0_6 = arith.constant 0 : index
    %c0_7 = arith.constant 0 : index
    %12 = vector.load %arg2[%c0_6, %c0_7] : memref<768x384xf32, #tpu.memory_space<vmem>>, vector<768x384xf32>
    %cst_8 = arith.constant dense<0.000000e+00> : vector<128x384xf32>
    %13 = tpu.matmul %11, %12, %cst_8 {dimension_numbers = #tpu.dot_dimension_numbers<[1], [0], [0], [1], [0, 0, 1, 1], [], []>} : vector<128x768xf32>, vector<768x384xf32>, vector<128x384xf32> -> vector<128x384xf32>
    %14 = vector.broadcast %10 : vector<1x384xf32> to vector<128x384xf32>
    %15 = arith.addf %13, %14 : vector<128x384xf32>
    %c0_9 = arith.constant 0 : index
    %c0_10 = arith.constant 0 : index
    %16 = vector.load %arg13[%c0_9, %c0_10] : memref<128x384xf32, #tpu.memory_space<vmem>>, vector<128x384xf32>
    tpu.vector_store %arg13[%c0_9, %c0_10], %15 {strides = array<i32>} : memref<128x384xf32, #tpu.memory_space<vmem>>, vector<128x384xf32>,
    %c0_11 = arith.constant 0 : index
    %c256 = arith.constant 256 : index
    %17 = vector.load %arg5[%c0_11, %c256] : memref<1x384xf32, #tpu.memory_space<vmem>>, vector<1x128xf32>
    %18 = vector.shape_cast %17 : vector<1x128xf32> to vector<1x128xf32>
    %19 = vector.broadcast %18 : vector<1x128xf32> to vector<8x128xf32>
    %c0_i32_12 = arith.constant 0 : i32
    %20 = arith.subi %c0_i32_12, %arg0 : i32
    %c16_i32 = arith.constant 16 : i32
    %21 = arith.muli %20, %c16_i32 : i32
    %c0_13 = arith.constant 0 : index
    %c0_14 = arith.constant 0 : index
    %22 = vector.load %arg14[%c0_13, %c0_14] : memref<8x128xf32, #tpu.memory_space<vmem>>, vector<8x128xf32>
    %c0_i32_15 = arith.constant 0 : i32
    %c16_i32_16 = arith.constant 16 : i32
    %23 = arith.addi %c0_i32_15, %c16_i32_16 : i32
    %c1_i32 = arith.constant 1 : i32
    %24 = scf.for %arg15 = %c0_i32_15 to %23 step %c1_i32 iter_args(%arg16 = %22) -> (vector<8x128xf32>)  : i32 {
      %c15_i32 = arith.constant 15 : i32
      %29 = arith.subi %c15_i32, %arg15 : i32
      %c8_i32 = arith.constant 8 : i32
      %30 = arith.muli %29, %c8_i32 : i32
      %31 = tpu.assume_multiple %30, 8 : i32
      %32 = arith.index_cast %31 : i32 to index
      %c0_22 = arith.constant 0 : index
      %33 = vector.load %arg13[%32, %c0_22] : memref<128x384xf32, #tpu.memory_space<vmem>>, vector<8x384xf32>
      %c0_23 = arith.constant 0 : index
      %c0_24 = arith.constant 0 : index
      %34 = vector.load %arg3[%c0_23, %c0_24] : memref<128x384xf32, #tpu.memory_space<vmem>>, vector<128x384xf32>
      %cst_25 = arith.constant dense<0.000000e+00> : vector<8x384xf32>
      %35 = tpu.matmul %arg16, %34, %cst_25 {dimension_numbers = #tpu.dot_dimension_numbers<[1], [0], [0], [1], [0, 0, 1, 1], [], []>} : vector<8x128xf32>, vector<128x384xf32>, vector<8x384xf32> -> vector<8x384xf32>
      %36 = vector.extract_strided_slice %33 {offsets = [0, 0], sizes = [8, 256], strides = [1, 1]} : vector<8x384xf32> to vector<8x256xf32>
      %37 = vector.extract_strided_slice %35 {offsets = [0, 0], sizes = [8, 256], strides = [1, 1]} : vector<8x384xf32> to vector<8x256xf32>
      %38 = arith.addf %36, %37 : vector<8x256xf32>
      %39 = arith.negf %38 : vector<8x256xf32>
      %40 = math.exp %39 : vector<8x256xf32>
      %cst_26 = arith.constant 1.000000e+00 : f32
      %41 = vector.broadcast %cst_26 : f32 to vector<8x256xf32>
      %42 = arith.addf %41, %40 : vector<8x256xf32>
      %43 = arith.divf %41, %42 : vector<8x256xf32>
      %44 = vector.extract_strided_slice %43 {offsets = [0, 0], sizes = [8, 128], strides = [1, 1]} : vector<8x256xf32> to vector<8x128xf32>
      %45 = vector.extract_strided_slice %43 {offsets = [0, 128], sizes = [8, 128], strides = [1, 1]} : vector<8x256xf32> to vector<8x128xf32>
      %46 = vector.extract_strided_slice %33 {offsets = [0, 256], sizes = [8, 128], strides = [1, 1]} : vector<8x384xf32> to vector<8x128xf32>
      %47 = vector.extract_strided_slice %35 {offsets = [0, 256], sizes = [8, 128], strides = [1, 1]} : vector<8x384xf32> to vector<8x128xf32>
      %48 = arith.addf %47, %19 : vector<8x128xf32>
      %49 = arith.mulf %44, %48 : vector<8x128xf32>
      %50 = arith.addf %46, %49 : vector<8x128xf32>
      %51 = math.tanh %50 : vector<8x128xf32>
      %cst_27 = arith.constant 1.000000e+00 : f32
      %52 = vector.broadcast %cst_27 : f32 to vector<8x128xf32>
      %53 = arith.subf %52, %45 : vector<8x128xf32>
      %54 = arith.mulf %53, %51 : vector<8x128xf32>
      %55 = arith.mulf %45, %arg16 : vector<8x128xf32>
      %56 = arith.addf %54, %55 : vector<8x128xf32>
      %57 = arith.addi %21, %29 : i32
      %c8_i32_28 = arith.constant 8 : i32
      %58 = arith.cmpi slt, %57, %c8_i32_28 : i32
      %59 = arith.select %58, %56, %arg16 : vector<8x128xf32>
      scf.yield %59 : vector<8x128xf32>
    }
    %c16_i32_17 = arith.constant 16 : i32
    %c0_18 = arith.constant 0 : index
    %c0_19 = arith.constant 0 : index
    %25 = vector.load %arg14[%c0_18, %c0_19] : memref<8x128xf32, #tpu.memory_space<vmem>>, vector<8x128xf32>
    tpu.vector_store %arg14[%c0_18, %c0_19], %24 {strides = array<i32>} : memref<8x128xf32, #tpu.memory_space<vmem>>, vector<8x128xf32>,
    %c0_i32_20 = arith.constant 0 : i32
    %26 = arith.cmpi eq, %arg0, %c0_i32_20 : i32
    %27 = arith.extui %26 : i1 to i32
    %c0_i32_21 = arith.constant 0 : i32
    %28 = arith.cmpi ne, %27, %c0_i32_21 : i32
    scf.if %28 {
      %c0_22 = arith.constant 0 : index
      %c0_23 = arith.constant 0 : index
      %29 = vector.load %arg14[%c0_22, %c0_23] : memref<8x128xf32, #tpu.memory_space<vmem>>, vector<8x128xf32>
      %c0_24 = arith.constant 0 : index
      %c0_25 = arith.constant 0 : index
      %30 = vector.load %arg6[%c0_24, %c0_25] : memref<128x64xf32, #tpu.memory_space<vmem>>, vector<128x64xf32>
      %cst_26 = arith.constant dense<0.000000e+00> : vector<8x64xf32>
      %31 = tpu.matmul %29, %30, %cst_26 {dimension_numbers = #tpu.dot_dimension_numbers<[1], [0], [0], [1], [0, 0, 1, 1], [], []>} : vector<8x128xf32>, vector<128x64xf32>, vector<8x64xf32> -> vector<8x64xf32>
      %c0_27 = arith.constant 0 : index
      %c0_28 = arith.constant 0 : index
      %32 = vector.load %arg7[%c0_27, %c0_28] : memref<1x64xf32, #tpu.memory_space<vmem>>, vector<1x64xf32>
      %33 = vector.broadcast %32 : vector<1x64xf32> to vector<8x64xf32>
      %34 = arith.addf %31, %33 : vector<8x64xf32>
      %cst_29 = arith.constant 0.000000e+00 : f32
      %35 = vector.broadcast %cst_29 : f32 to vector<8x64xf32>
      %36 = arith.maximumf %34, %35 : vector<8x64xf32>
      %c0_30 = arith.constant 0 : index
      %c0_31 = arith.constant 0 : index
      %37 = vector.load %arg8[%c0_30, %c0_31] : memref<64x16xf32, #tpu.memory_space<vmem>>, vector<64x16xf32>
      %cst_32 = arith.constant dense<0.000000e+00> : vector<8x16xf32>
      %38 = tpu.matmul %36, %37, %cst_32 {dimension_numbers = #tpu.dot_dimension_numbers<[1], [0], [0], [1], [0, 0, 1, 1], [], []>} : vector<8x64xf32>, vector<64x16xf32>, vector<8x16xf32> -> vector<8x16xf32>
      %c0_33 = arith.constant 0 : index
      %c0_34 = arith.constant 0 : index
      %39 = vector.load %arg9[%c0_33, %c0_34] : memref<1x16xf32, #tpu.memory_space<vmem>>, vector<1x16xf32>
      %40 = vector.broadcast %39 : vector<1x16xf32> to vector<8x16xf32>
      %41 = arith.addf %38, %40 : vector<8x16xf32>
      %cst_35 = arith.constant 0.000000e+00 : f32
      %42 = vector.broadcast %cst_35 : f32 to vector<8x16xf32>
      %43 = arith.maximumf %41, %42 : vector<8x16xf32>
      %c0_36 = arith.constant 0 : index
      %c0_37 = arith.constant 0 : index
      %44 = vector.load %arg10[%c0_36, %c0_37] : memref<16x1xf32, #tpu.memory_space<vmem>>, vector<16x1xf32>
      %cst_38 = arith.constant dense<0.000000e+00> : vector<8x1xf32>
      %45 = tpu.matmul %43, %44, %cst_38 {dimension_numbers = #tpu.dot_dimension_numbers<[1], [0], [0], [1], [0, 0, 1, 1], [], []>} : vector<8x16xf32>, vector<16x1xf32>, vector<8x1xf32> -> vector<8x1xf32>
      %c0_39 = arith.constant 0 : index
      %c0_40 = arith.constant 0 : index
      %46 = vector.load %arg11[%c0_39, %c0_40] : memref<1x1xf32, #tpu.memory_space<vmem>>, vector<1x1xf32>
      %47 = vector.broadcast %46 : vector<1x1xf32> to vector<8x1xf32>
      %48 = arith.addf %45, %47 : vector<8x1xf32>
      %49 = arith.negf %48 : vector<8x1xf32>
      %50 = math.exp %49 : vector<8x1xf32>
      %cst_41 = arith.constant 1.000000e+00 : f32
      %51 = vector.broadcast %cst_41 : f32 to vector<8x1xf32>
      %52 = arith.addf %51, %50 : vector<8x1xf32>
      %53 = arith.divf %51, %52 : vector<8x1xf32>
      %cst_42 = arith.constant 1.000000e+01 : f32
      %54 = vector.broadcast %cst_42 : f32 to vector<8x1xf32>
      %55 = arith.mulf %53, %54 : vector<8x1xf32>
      %c0_43 = arith.constant 0 : index
      %c0_44 = arith.constant 0 : index
      %56 = vector.load %arg12[%c0_43, %c0_44] : memref<8x1xf32, #tpu.memory_space<vmem>>, vector<8x1xf32>
      tpu.vector_store %arg12[%c0_43, %c0_44], %55 {strides = array<i32>} : memref<8x1xf32, #tpu.memory_space<vmem>>, vector<8x1xf32>,
    } else {
    }
    return
  }
  func.func @transform_0(%arg0: i32) -> (i32, i32) {
    %c0_i32 = arith.constant 0 : i32
    %0 = arith.subi %c0_i32, %arg0 : i32
    %c0_i32_0 = arith.constant 0 : i32
    %c0_i32_1 = arith.constant 0 : i32
    return %0, %c0_i32_0 : i32, i32
  }
  func.func @transform_1(%arg0: i32) -> (i32, i32) {
    %c0_i32 = arith.constant 0 : i32
    %c0_i32_0 = arith.constant 0 : i32
    %c0_i32_1 = arith.constant 0 : i32
    return %c0_i32, %c0_i32_0 : i32, i32
  }
  func.func @transform_2(%arg0: i32) -> (i32, i32) {
    %c0_i32 = arith.constant 0 : i32
    %c0_i32_0 = arith.constant 0 : i32
    %c0_i32_1 = arith.constant 0 : i32
    return %c0_i32, %c0_i32_0 : i32, i32
  }
  func.func @transform_3(%arg0: i32) -> (i32, i32) {
    %c0_i32 = arith.constant 0 : i32
    %c0_i32_0 = arith.constant 0 : i32
    %c0_i32_1 = arith.constant 0 : i32
    return %c0_i32, %c0_i32_0 : i32, i32
  }
  func.func @transform_4(%arg0: i32) -> (i32, i32) {
    %c0_i32 = arith.constant 0 : i32
    %c0_i32_0 = arith.constant 0 : i32
    %c0_i32_1 = arith.constant 0 : i32
    return %c0_i32, %c0_i32_0 : i32, i32
  }
  func.func @transform_5(%arg0: i32) -> (i32, i32) {
    %c0_i32 = arith.constant 0 : i32
    %c0_i32_0 = arith.constant 0 : i32
    %c0_i32_1 = arith.constant 0 : i32
    return %c0_i32, %c0_i32_0 : i32, i32
  }
  func.func @transform_6(%arg0: i32) -> (i32, i32) {
    %c0_i32 = arith.constant 0 : i32
    %c0_i32_0 = arith.constant 0 : i32
    %c0_i32_1 = arith.constant 0 : i32
    return %c0_i32, %c0_i32_0 : i32, i32
  }
  func.func @transform_7(%arg0: i32) -> (i32, i32) {
    %c0_i32 = arith.constant 0 : i32
    %c0_i32_0 = arith.constant 0 : i32
    %c0_i32_1 = arith.constant 0 : i32
    return %c0_i32, %c0_i32_0 : i32, i32
  }
  func.func @transform_8(%arg0: i32) -> (i32, i32) {
    %c0_i32 = arith.constant 0 : i32
    %c0_i32_0 = arith.constant 0 : i32
    %c0_i32_1 = arith.constant 0 : i32
    return %c0_i32, %c0_i32_0 : i32, i32
  }
  func.func @transform_9(%arg0: i32) -> (i32, i32) {
    %c0_i32 = arith.constant 0 : i32
    %c0_i32_0 = arith.constant 0 : i32
    %c0_i32_1 = arith.constant 0 : i32
    return %c0_i32, %c0_i32_0 : i32, i32
  }
  func.func @transform_10(%arg0: i32) -> (i32, i32) {
    %c0_i32 = arith.constant 0 : i32
    %c0_i32_0 = arith.constant 0 : i32
    %c0_i32_1 = arith.constant 0 : i32
    return %c0_i32, %c0_i32_0 : i32, i32
  }
  func.func @transform_11(%arg0: i32) -> (i32, i32) {
    %c0_i32 = arith.constant 0 : i32
    %c0_i32_0 = arith.constant 0 : i32
    %c0_i32_1 = arith.constant 0 : i32
    return %c0_i32, %c0_i32_0 : i32, i32
  }
}

</mosaic_0001>

<bundles_post_ra>
// kernel: sentiment_forward.1
= control target key start
LH: loop header
LB: loop body
LE: loop exit
PB: predicated region body
PF: predicated region fallthrough
CT: control target
= control target key end

     0   :  { %s4241_s0 = inlined_call_operand.vmem [shape: f32[128,768], index: 0, kind: input, shape index: {}]   ;;  %s4242_s1 = inlined_call_operand.hbm [shape: f32[768,384], index: 1, kind: input, shape index: {}]   ;;  %s4243_s2 = inlined_call_operand.hbm [shape: f32[128,384], index: 2, kind: input, shape index: {}]   ;;  %s4244_s3 = inlined_call_operand.hbm [shape: f32[1,384], index: 3, kind: input, shape index: {}]   ;;  %s4245_s4 = inlined_call_operand.hbm [shape: f32[1,384], index: 4, kind: input, shape index: {}]   ;;  %s4246_s5 = inlined_call_operand.vmem [shape: f32[128,64], index: 5, kind: input, shape index: {}]   ;;  %s4247_s6 = inlined_call_operand.hbm [shape: f32[1,64], index: 6, kind: input, shape index: {}]   ;;  %s4248_s7 = inlined_call_operand.vmem [shape: f32[64,16], index: 7, kind: input, shape index: {}]   ;;  %s4249_s8 = inlined_call_operand.hbm [shape: f32[1,16], index: 8, kind: input, shape index: {}]   ;;  %s4250_s9 = inlined_call_operand.vmem [shape: f32[16,1], index: 9, kind: input, shape index: {}]   ;;  %s4251_s10 = inlined_call_operand.<no memory space> [shape: f32[1,1], index: 10, kind: input, shape index: {}]   ;;  %s4252_s11 = inlined_call_operand.vmem [shape: f32[8,1], index: 11, kind: output, shape index: {}]  }
   0x1   :  { %v16_v0 = vstv %s4251_s10 }
   0x2   :  { %17 = vst [vmem:[#allocation4] sm:$0x1] %v16_v0 }
   0x3   :  { %18 = vsyncpa [#allocation6], 0 }
   0x4   :  { %19 = vsyncpa [#allocation8], 0 }
   0x5   :  { %20 = vsyncpa [#allocation11], 0 }
   0x6   :  { %21 = vsyncpa [#allocation14], 0  ;;  %s3189_s19 = smov [#allocation7]   ;;  %s3190_s21 = smov [#allocation10]  }
   0x7   :  { %s50_s20 = sshll.u32 %s3189_s19, 4  ;;  %s73_s22 = sshll.u32 %s3190_s21, 4  ;;  %s51_s20 = int_to_ptr.vmem [resolvable:$true] %s50_s20  ;;  %s3267_s22 = int_to_ptr.vmem [resolvable:$true] %s73_s22 }
   0x8   :  { %s3033_s25 = scalar_lea.hbm %s4243_s2, 6144 }
   0x9   :  { %p3034_p0 = scmp.ne.s32.totalorder %s4243_s2, %s3033_s25  ;;  %p3037_p1 = scmp.lt.u32.totalorder %s3033_s25, %s4243_s2 }
   0xb   :  { %p3039_p2 = pnand %p3037_p1, %p3034_p0 }
   0xd   :  { %3042 = shalt.err (!%p3039_p2)
}
   0xe   :  { %s3043_s29 = scalar_lea.vmem %s51_s20, 6144  ;;  %p3048_p4 = scmp.lt.s32.totalorder %s51_s20, %s51_s20 }
   0xf   :  { %p3044_p3 = scmp.ne.s32.totalorder %s51_s20, %s3043_s29  ;;  %p3049_p5 = scmp.lt.s32.totalorder %s3043_s29, %s3043_s29 }
  0x11   :  { %p3050_p6 = por %p3049_p5, %p3048_p4 }
  0x13   :  { %p3051_p7 = pnand %p3050_p6, %p3044_p3 }
  0x15   :  { %3054 = shalt.err (!%p3051_p7)
}
  0x16   :  { %s3191_s30 = smov 384   ;;  %s3192_s12 = smov 24  }
  0x17   :  { %56 = dma.hbm_to_vmem [thread:$0]  %s4243_s2, 6144, %s51_s20, [#allocation8], %s3191_s30, %s3191_s30, %s3192_s12  }
  0x18   :  { %s3055_s17 = scalar_lea.hbm %s4245_s4, 48 }
  0x19   :  { %p3056_p8 = scmp.ne.s32.totalorder %s4245_s4, %s3055_s17  ;;  %p3059_p9 = scmp.lt.u32.totalorder %s3055_s17, %s4245_s4 }
  0x1b   :  { %p3061_p10 = pnand %p3059_p9, %p3056_p8 }
  0x1d   :  { %3064 = shalt.err (!%p3061_p10)
}
  0x1e   :  { %s3065_s24 = scalar_lea.vmem %s3267_s22, 48  ;;  %s3069_s2 = scalar_lea.vmem %s3267_s22, 64 }
  0x1f   :  { %p3066_p11 = scmp.ne.s32.totalorder %s3267_s22, %s3065_s24  ;;  %p3070_p12 = scmp.lt.s32.totalorder %s3267_s22, %s3267_s22 }
  0x20   :  { %p3071_p13 = scmp.lt.s32.totalorder %s3069_s2, %s3065_s24 }
  0x22   :  { %p3072_p0 = por %p3071_p13, %p3070_p12 }
  0x24   :  { %p3073_p1 = pnand %p3072_p0, %p3066_p11 }
  0x26   :  { %3076 = shalt.err (!%p3073_p1)
}
  0x27   :  { %76 = dma.hbm_to_vmem [thread:$0]  %s4245_s4, 48, %s3267_s22, [#allocation11]  }
  0x28   :  { %s3193_s26 = smov [#allocation5]   ;;  %s3194_s10 = smov [#allocation9]  }
  0x29   :  { %s38_s27 = sshll.u32 %s3193_s26, 4  ;;  %s63_s28 = sshll.u32 %s3194_s10, 4  ;;  %s39_s27 = int_to_ptr.vmem [resolvable:$true] %s38_s27  ;;  %s64_s28 = int_to_ptr.vmem [resolvable:$true] %s63_s28 }
  0x2a   :  { %s3077_s14 = scalar_lea.hbm %s4242_s1, 36864 }
  0x2b   :  { %p3078_p2 = scmp.ne.s32.totalorder %s4242_s1, %s3077_s14  ;;  %p3081_p3 = scmp.lt.u32.totalorder %s3077_s14, %s4242_s1 }
  0x2d   :  { %p3083_p4 = pnand %p3081_p3, %p3078_p2 }
  0x2f   :  { %3086 = shalt.err (!%p3083_p4)
}
  0x30   :  { %s3087_s4 = scalar_lea.vmem %s39_s27, 36864  ;;  %p3092_p6 = scmp.lt.s32.totalorder %s39_s27, %s39_s27 }
  0x31   :  { %p3088_p5 = scmp.ne.s32.totalorder %s39_s27, %s3087_s4  ;;  %p3093_p7 = scmp.lt.s32.totalorder %s3087_s4, %s3087_s4 }
  0x33   :  { %p3094_p8 = por %p3093_p7, %p3092_p6 }
  0x35   :  { %p3095_p9 = pnand %p3094_p8, %p3088_p5 }
  0x37   :  { %3098 = shalt.err (!%p3095_p9)
}
  0x38   :  { %44 = dma.hbm_to_vmem [thread:$0]  %s4242_s1, 36864, %s39_s27, [#allocation6], %s3191_s30, %s3191_s30, %s3192_s12  }
  0x39   :  { %s3099_s24 = scalar_lea.hbm %s4244_s3, 48 }
  0x3a   :  { %p3100_p10 = scmp.ne.s32.totalorder %s4244_s3, %s3099_s24  ;;  %p3103_p11 = scmp.lt.u32.totalorder %s3099_s24, %s4244_s3 }
  0x3c   :  { %p3105_p12 = pnand %p3103_p11, %p3100_p10 }
  0x3e   :  { %3108 = shalt.err (!%p3105_p12)
}
  0x3f   :  { %s3109_s10 = scalar_lea.vmem %s64_s28, 48  ;;  %s3113_s29 = scalar_lea.vmem %s64_s28, 64 }
  0x40   :  { %p3110_p13 = scmp.ne.s32.totalorder %s64_s28, %s3109_s10  ;;  %p3114_p0 = scmp.lt.s32.totalorder %s64_s28, %s64_s28 }
  0x41   :  { %p3115_p1 = scmp.lt.s32.totalorder %s3113_s29, %s3109_s10 }
  0x43   :  { %p3116_p2 = por %p3115_p1, %p3114_p0 }
  0x45   :  { %p3117_p3 = pnand %p3116_p2, %p3110_p13 }
  0x47   :  { %3120 = shalt.err (!%p3117_p3)
}
  0x48   :  { %66 = dma.hbm_to_vmem [thread:$0]  %s4244_s3, 48, %s64_s28, [#allocation8]  }
  0x49   :  { %s3195_s12 = smov [#allocation12]   ;;  %s3196_s13 = smov [#allocation13]  }
  0x4a   :  { %s85_s27 = sshll.u32 %s3195_s12, 4  ;;  %s97_s14 = sshll.u32 %s3196_s13, 4  ;;  %s86_s27 = int_to_ptr.vmem [resolvable:$true] %s85_s27  ;;  %s98_s14 = int_to_ptr.vmem [resolvable:$true] %s97_s14 }
  0x4b   :  { %s3121_s17 = scalar_lea.hbm %s4247_s6, 16 }
  0x4c   :  { %p3122_p4 = scmp.ne.s32.totalorder %s4247_s6, %s3121_s17  ;;  %p3125_p5 = scmp.lt.u32.totalorder %s3121_s17, %s4247_s6 }
  0x4e   :  { %p3127_p6 = pnand %p3125_p5, %p3122_p4 }
  0x50   :  { %3130 = shalt.err (!%p3127_p6)
}
  0x51   :  { %s3131_s3 = scalar_lea.vmem %s86_s27, 16  ;;  %s3135_s28 = scalar_lea.vmem %s86_s27, 32 }
  0x52   :  { %p3132_p7 = scmp.ne.s32.totalorder %s86_s27, %s3131_s3  ;;  %p3136_p8 = scmp.lt.s32.totalorder %s86_s27, %s86_s27 }
  0x53   :  { %p3137_p9 = scmp.lt.s32.totalorder %s3135_s28, %s3131_s3 }
  0x55   :  { %p3138_p10 = por %p3137_p9, %p3136_p8 }
  0x57   :  { %p3139_p11 = pnand %p3138_p10, %p3132_p7 }
  0x59   :  { %3142 = shalt.err (!%p3139_p11)
}
  0x5a   :  { %88 = dma.hbm_to_vmem [thread:$0]  %s4247_s6, 16, %s86_s27, [#allocation11]  }
  0x5b   :  { %s3143_s20 = scalar_lea.hbm %s4249_s8, 16 }
  0x5c   :  { %p3144_p12 = scmp.ne.s32.totalorder %s4249_s8, %s3143_s20  ;;  %p3147_p13 = scmp.lt.u32.totalorder %s3143_s20, %s4249_s8 }
  0x5e   :  { %p3149_p0 = pnand %p3147_p13, %p3144_p12 }
  0x60   :  { %3152 = shalt.err (!%p3149_p0)
}
  0x61   :  { %s3153_s1 = scalar_lea.vmem %s98_s14, 16  ;;  %s3157_s30 = scalar_lea.vmem %s98_s14, 32 }
  0x62   :  { %p3154_p1 = scmp.ne.s32.totalorder %s98_s14, %s3153_s1  ;;  %p3158_p2 = scmp.lt.s32.totalorder %s98_s14, %s98_s14 }
  0x63   :  { %p3159_p3 = scmp.lt.s32.totalorder %s3157_s30, %s3153_s1 }
  0x65   :  { %p3160_p4 = por %p3159_p3, %p3158_p2 }
  0x67   :  { %p3161_p5 = pnand %p3160_p4, %p3154_p1 }
  0x69   :  { %3164 = shalt.err (!%p3161_p5)
}
  0x6a   :  { %100 = dma.hbm_to_vmem [thread:$0]  %s4249_s8, 16, %s98_s14, [#allocation14]  }
  0x6b   :  { %3173 = dma.done.wait [#allocation6], 36864  }
  0x6c   :  { %3174 = vsyncadd [#allocation6], 4294930432 }
  0x6d   :  { %3175 = dma.done.wait [#allocation8], 6192  }
  0x6e   :  { %3176 = vsyncadd [#allocation8], 4294961104 }
  0x6f   :  { %3177 = dma.done.wait [#allocation11], 64  }
  0x70   :  { %3178 = vsyncadd [#allocation11], 4294967232 }
  0x71   :  { %3179 = dma.done.wait [#allocation14], 16  }
  0x72   :  { %3180 = vsyncadd [#allocation14], 4294967280  ;;  %v3353_v1 = vld [vmem:[#allocation10 + $0x2] ss:$0 sm:$0xff]  ;;  %v297_v2 = vld [vmem:[#allocation5 + $0x8] sm:$0xff] }
  0x73   :  { %v300_v3 = vld [vmem:[#allocation5 + $0x20] sm:$0xff]  ;;  %v346_v5 = vld [vmem:[#allocation5 + $0x190] sm:$0xff]  ;;  %v349_v6 = vld [vmem:[#allocation5 + $0x1a8] sm:$0xff] }
  0x74   :  { %v2509_v4 = vpack.c.bf16 %v300_v3, %v297_v2  ;;  %v296_v7 = vld [vmem:[#allocation5] sm:$0xff]  ;;  %v2701_v8 = vpack.c.bf16 %v349_v6, %v346_v5  ;;  %v299_v9 = vld [vmem:[#allocation5 + $0x18] sm:$0xff]  ;;  %v298_v10 = vld [vmem:[#allocation5 + $0x10] sm:$0xff] }
  0x75   :  { %v301_v11 = vld [vmem:[#allocation5 + $0x28] sm:$0xff]  ;;  %v2511_v12 = vpack.c.bf16 %v299_v9, %v296_v7  ;;  %v303_v14 = vld [vmem:[#allocation5 + $0x38] sm:$0xff]  ;;  %v306_v15 = vld [vmem:[#allocation5 + $0x50] sm:$0xff] }
  0x76   :  { %2510 = vmatprep.subr.bf16.mxu0 %v2509_v4  ;;  %v2703_v13 = vpack.c.bf16 %v301_v11, %v298_v10  ;;  %v352_v16 = vld [vmem:[#allocation5 + $0x1c0] sm:$0xff]  ;;  %2702 = vmatprep.subr.bf16.mxu1 %v2701_v8  ;;  %v2513_v17 = vpack.c.bf16 %v306_v15, %v303_v14  ;;  %v355_v18 = vld [vmem:[#allocation5 + $0x1d8] sm:$0xff]  ;;  %v302_v19 = vld [vmem:[#allocation5 + $0x30] sm:$0xff] }
  0x77   :  { %v305_v20 = vld [vmem:[#allocation5 + $0x48] sm:$0xff]  ;;  %2512 = vmatpush1.bf16.msra.mxu0 %v2511_v12  ;;  %v2705_v21 = vpack.c.bf16 %v355_v18, %v352_v16  ;;  %v304_v23 = vld [vmem:[#allocation5 + $0x40] sm:$0xff]  ;;  %v307_v24 = vld [vmem:[#allocation5 + $0x58] sm:$0xff] }
  0x78   :  { %2704 = vmatpush3.bf16.msra.mxu1 %v2703_v13  ;;  %v2515_v22 = vpack.c.bf16 %v305_v20, %v302_v19  ;;  %v309_v25 = vld [vmem:[#allocation5 + $0x68] sm:$0xff]  ;;  %2514 = vmatprep.subr.bf16.mxu0 %v2513_v17  ;;  %v2707_v26 = vpack.c.bf16 %v307_v24, %v304_v23  ;;  %v312_v27 = vld [vmem:[#allocation5 + $0x80] sm:$0xff]  ;;  %v358_v28 = vld [vmem:[#allocation5 + $0x1f0] sm:$0xff] }
  0x79   :  { %v361_v29 = vld [vmem:[#allocation5 + $0x208] sm:$0xff]  ;;  %2706 = vmatprep.subr.bf16.mxu1 %v2705_v21  ;;  %v2517_v30 = vpack.c.bf16 %v312_v27, %v309_v25  ;;  %v308_v32 = vld [vmem:[#allocation5 + $0x60] sm:$0xff]  ;;  %v311_v33 = vld [vmem:[#allocation5 + $0x78] sm:$0xff] }
  0x7a   :  { %v2709_v31 = vpack.c.bf16 %v361_v29, %v358_v28  ;;  %v310_v34 = vld [vmem:[#allocation5 + $0x70] sm:$0xff]  ;;  %v313_v35 = vld [vmem:[#allocation5 + $0x88] sm:$0xff]  ;;  %v315_v36 = vld [vmem:[#allocation5 + $0x98] sm:$0xff]  ;;  %v2519_v38 = vpack.c.bf16 %v311_v33, %v308_v32 }
  0x7b   :  { %v318_v37 = vld [vmem:[#allocation5 + $0xb0] sm:$0xff]  ;;  %2516 = vmatpush1.bf16.msra.mxu0 %v2515_v22  ;;  %v2711_v39 = vpack.c.bf16 %v313_v35, %v310_v34  ;;  %v364_v40 = vld [vmem:[#allocation5 + $0x220] sm:$0xff]  ;;  %v367_v41 = vld [vmem:[#allocation5 + $0x238] sm:$0xff] }
  0x7c   :  { %2708 = vmatpush3.bf16.msra.mxu1 %v2707_v26  ;;  %v314_v42 = vld [vmem:[#allocation5 + $0x90] sm:$0xff]  ;;  %2518 = vmatprep.subr.bf16.mxu0 %v2517_v30  ;;  %v2521_v43 = vpack.c.bf16 %v318_v37, %v315_v36  ;;  %v2713_v44 = vpack.c.bf16 %v367_v41, %v364_v40  ;;  %v317_v45 = vld [vmem:[#allocation5 + $0xa8] sm:$0xff]  ;;  %v316_v46 = vld [vmem:[#allocation5 + $0xa0] sm:$0xff] }
  0x7d   :  { %2710 = vmatprep.subr.bf16.mxu1 %v2709_v31  ;;  %v319_v47 = vld [vmem:[#allocation5 + $0xb8] sm:$0xff]  ;;  %v321_v48 = vld [vmem:[#allocation5 + $0xc8] sm:$0xff]  ;;  %v324_v49 = vld [vmem:[#allocation5 + $0xe0] sm:$0xff]  ;;  %v2523_v52 = vpack.c.bf16 %v317_v45, %v314_v42 }
  0x7e   :  { %v370_v50 = vld [vmem:[#allocation5 + $0x250] sm:$0xff]  ;;  %v373_v51 = vld [vmem:[#allocation5 + $0x268] sm:$0xff]  ;;  %v2715_v53 = vpack.c.bf16 %v319_v47, %v316_v46  ;;  %v320_v54 = vld [vmem:[#allocation5 + $0xc0] sm:$0xff]  ;;  %v2525_v56 = vpack.c.bf16 %v324_v49, %v321_v48 }
  0x7f   :  { %2520 = vmatpush1.bf16.msra.mxu0 %v2519_v38  ;;  %v323_v55 = vld [vmem:[#allocation5 + $0xd8] sm:$0xff]  ;;  %v2717_v57 = vpack.c.bf16 %v373_v51, %v370_v50  ;;  %v322_v58 = vld [vmem:[#allocation5 + $0xd0] sm:$0xff]  ;;  %v325_v59 = vld [vmem:[#allocation5 + $0xe8] sm:$0xff] }
  0x80   :  { %2712 = vmatpush3.bf16.msra.mxu1 %v2711_v39  ;;  %2522 = vmatprep.subr.bf16.mxu0 %v2521_v43  ;;  %v327_v60 = vld [vmem:[#allocation5 + $0xf8] sm:$0xff]  ;;  %v330_v61 = vld [vmem:[#allocation5 + $0x110] sm:$0xff]  ;;  %v376_v62 = vld [vmem:[#allocation5 + $0x280] sm:$0xff]  ;;  %v2527_v0 = vpack.c.bf16 %v323_v55, %v320_v54  ;;  %v2719_v2 = vpack.c.bf16 %v325_v59, %v322_v58 }
  0x81   :  { %2714 = vmatprep.subr.bf16.mxu1 %v2713_v44  ;;  %v379_v63 = vld [vmem:[#allocation5 + $0x298] sm:$0xff]  ;;  %v326_v3 = vld [vmem:[#allocation5 + $0xf0] sm:$0xff]  ;;  %v329_v4 = vld [vmem:[#allocation5 + $0x108] sm:$0xff]  ;;  %v2529_v5 = vpack.c.bf16 %v330_v61, %v327_v60 }
  0x82   :  { %v2721_v6 = vpack.c.bf16 %v379_v63, %v376_v62  ;;  %v328_v7 = vld [vmem:[#allocation5 + $0x100] sm:$0xff]  ;;  %v331_v8 = vld [vmem:[#allocation5 + $0x118] sm:$0xff]  ;;  %v333_v9 = vld [vmem:[#allocation5 + $0x128] sm:$0xff]  ;;  %v2531_v13 = vpack.c.bf16 %v329_v4, %v326_v3 }
  0x83   :  { %2524 = vmatpush1.bf16.msra.mxu0 %v2523_v52  ;;  %v336_v10 = vld [vmem:[#allocation5 + $0x140] sm:$0xff]  ;;  %v382_v11 = vld [vmem:[#allocation5 + $0x2b0] sm:$0xff]  ;;  %v385_v12 = vld [vmem:[#allocation5 + $0x2c8] sm:$0xff]  ;;  %v2723_v14 = vpack.c.bf16 %v331_v8, %v328_v7 }
  0x84   :  { %2716 = vmatpush3.bf16.msra.mxu1 %v2715_v53  ;;  %2526 = vmatprep.subr.bf16.mxu0 %v2525_v56  ;;  %v332_v15 = vld [vmem:[#allocation5 + $0x120] sm:$0xff]  ;;  %v335_v16 = vld [vmem:[#allocation5 + $0x138] sm:$0xff]  ;;  %v2533_v18 = vpack.c.bf16 %v336_v10, %v333_v9  ;;  %v2725_v19 = vpack.c.bf16 %v385_v12, %v382_v11  ;;  %v334_v20 = vld [vmem:[#allocation5 + $0x130] sm:$0xff] }
  0x85   :  { %2718 = vmatprep.subr.bf16.mxu1 %v2717_v57  ;;  %v201_v17 = vld [vmem:[%s4241_s0 + $0x8] sm:$0xff]  ;;  %v339_v22 = vld [vmem:[#allocation5 + $0x158] sm:$0xff]  ;;  %v342_v23 = vld [vmem:[#allocation5 + $0x170] sm:$0xff]  ;;  %v2535_v26 = vpack.c.bf16 %v335_v16, %v332_v15 }
  0x86   :  { %v337_v21 = vld [vmem:[#allocation5 + $0x148] sm:$0xff]  ;;  %v388_v24 = vld [vmem:[#allocation5 + $0x2e0] sm:$0xff]  ;;  %v391_v25 = vld [vmem:[#allocation5 + $0x2f8] sm:$0xff]  ;;  %1147 = vmatprep.mubr.f32.mxu1 %v201_v17  ;;  %664 = vmatprep.mubr.f32.mxu0 %v201_v17  ;;  %v2537_v29 = vpack.c.bf16 %v342_v23, %v339_v22 }
  0x87   :  { %2528 = vmatpush1.bf16.msra.mxu0 %v2527_v0  ;;  %v2727_v27 = vpack.c.bf16 %v337_v21, %v334_v20  ;;  %v338_v28 = vld [vmem:[#allocation5 + $0x150] sm:$0xff]  ;;  %v2729_v30 = vpack.c.bf16 %v391_v25, %v388_v24  ;;  %v341_v31 = vld [vmem:[#allocation5 + $0x168] sm:$0xff]  ;;  %v340_v32 = vld [vmem:[#allocation5 + $0x160] sm:$0xff] }
  0x88   :  { %2720 = vmatpush3.bf16.msra.mxu1 %v2719_v2  ;;  %2530 = vmatprep.subr.bf16.mxu0 %v2529_v5  ;;  %v343_v33 = vld [vmem:[#allocation5 + $0x178] sm:$0xff]  ;;  %v345_v34 = vld [vmem:[#allocation5 + $0x188] sm:$0xff]  ;;  %v348_v35 = vld [vmem:[#allocation5 + $0x1a0] sm:$0xff]  ;;  %v2539_v36 = vpack.c.bf16 %v341_v31, %v338_v28 }
  0x89   :  { %2722 = vmatprep.subr.bf16.mxu1 %v2721_v6  ;;  %v2731_v37 = vpack.c.bf16 %v343_v33, %v340_v32  ;;  %v2541_v38 = vpack.c.bf16 %v348_v35, %v345_v34  ;;  %v344_v39 = vld [vmem:[#allocation5 + $0x180] sm:$0xff]  ;;  %v347_v40 = vld [vmem:[#allocation5 + $0x198] sm:$0xff]  ;;  %v354_v42 = vld [vmem:[#allocation5 + $0x1d0] sm:$0xff] }
  0x8a   :  { %v351_v41 = vld [vmem:[#allocation5 + $0x1b8] sm:$0xff]  ;;  %v2543_v44 = vpack.c.bf16 %v347_v40, %v344_v39  ;;  %v350_v47 = vld [vmem:[#allocation5 + $0x1b0] sm:$0xff]  ;;  %v353_v48 = vld [vmem:[#allocation5 + $0x1c8] sm:$0xff] }
  0x8b   :  { %2532 = vmatpush1.bf16.msra.mxu0 %v2531_v13  ;;  %v3361_v43 = vld [vmem:[%s4241_s0] sm:$0xff]  ;;  %v3366_v45 = vld [vmem:[%s4241_s0 + $0x38] sm:$0xff]  ;;  %v2545_v46 = vpack.c.bf16 %v354_v42, %v351_v41  ;;  %v357_v49 = vld [vmem:[#allocation5 + $0x1e8] sm:$0xff]  ;;  %v2547_v52 = vpack.c.bf16 %v353_v48, %v350_v47 }
  0x8c   :  { %2724 = vmatpush3.bf16.msra.mxu1 %v2723_v14  ;;  %2534 = vmatprep.subr.bf16.mxu0 %v2533_v18  ;;  %v360_v50 = vld [vmem:[#allocation5 + $0x200] sm:$0xff]  ;;  %v3372_v51 = vld [vmem:[%s4241_s0 + $0x30] sm:$0xff]  ;;  %v359_v57 = vld [vmem:[#allocation5 + $0x1f8] sm:$0xff] }
  0x8d   :  { %2726 = vmatprep.subr.bf16.mxu1 %v2725_v19  ;;  %v3378_v53 = vld [vmem:[%s4241_s0 + $0x68] sm:$0xff]  ;;  %v442_v55 = vld [vmem:[#allocation5 + $0x490] sm:$0xff]  ;;  %v2549_v56 = vpack.c.bf16 %v360_v50, %v357_v49  ;;  %v363_v60 = vld [vmem:[#allocation5 + $0x218] sm:$0xff] }
  0x8e   :  { %v356_v54 = vld [vmem:[#allocation5 + $0x1e0] sm:$0xff]  ;;  %v445_v58 = vld [vmem:[#allocation5 + $0x4a8] sm:$0xff]  ;;  %v394_v59 = vld [vmem:[#allocation5 + $0x310] sm:$0xff] }
  0x8f   :  { %2536 = vmatpush1.bf16.msra.mxu0 %v2535_v26  ;;  %v366_v61 = vld [vmem:[#allocation5 + $0x230] sm:$0xff]  ;;  %v2733_v62 = vpack.c.bf16 %v445_v58, %v442_v55  ;;  %v397_v63 = vld [vmem:[#allocation5 + $0x328] sm:$0xff]  ;;  %v3385_v2 = vld [vmem:[%s4241_s0 + $0x60] sm:$0xff]  ;;  %v2551_v3 = vpack.c.bf16 %v359_v57, %v356_v54 }
  0x90   :  { %2728 = vmatpush3.bf16.msra.mxu1 %v2727_v27  ;;  %2538 = vmatprep.subr.bf16.mxu0 %v2537_v29  ;;  %v2735_v0 = vpack.c.bf16 %v397_v63, %v394_v59  ;;  %v3390_v4 = vld [vmem:[%s4241_s0 + $0x98] sm:$0xff]  ;;  %v2553_v6 = vpack.c.bf16 %v366_v61, %v363_v60  ;;  %v365_v7 = vld [vmem:[#allocation5 + $0x228] sm:$0xff]  ;;  %v448_v8 = vld [vmem:[#allocation5 + $0x4c0] sm:$0xff] }
  0x91   :  { %2730 = vmatprep.subr.bf16.mxu1 %v2729_v30  ;;  %v362_v5 = vld [vmem:[#allocation5 + $0x210] sm:$0xff]  ;;  %v451_v9 = vld [vmem:[#allocation5 + $0x4d8] sm:$0xff]  ;;  %v369_v10 = vld [vmem:[#allocation5 + $0x248] sm:$0xff] }
  0x92   :  { %v372_v11 = vld [vmem:[#allocation5 + $0x260] sm:$0xff]  ;;  %v2737_v12 = vpack.c.bf16 %v451_v9, %v448_v8  ;;  %v3396_v14 = vld [vmem:[%s4241_s0 + $0x90] sm:$0xff]  ;;  %v403_v15 = vld [vmem:[#allocation5 + $0x358] sm:$0xff]  ;;  %v2555_v16 = vpack.c.bf16 %v365_v7, %v362_v5 }
  0x93   :  { %2540 = vmatpush1.bf16.msra.mxu0 %v2539_v36  ;;  %v400_v13 = vld [vmem:[#allocation5 + $0x340] sm:$0xff]  ;;  %v454_v20 = vld [vmem:[#allocation5 + $0x4f0] sm:$0xff]  ;;  %v2557_v21 = vpack.c.bf16 %v372_v11, %v369_v10  ;;  %v371_v22 = vld [vmem:[#allocation5 + $0x258] sm:$0xff] }
  0x94   :  { %2732 = vmatpush3.bf16.msra.mxu1 %v2731_v37  ;;  %2542 = vmatprep.subr.bf16.mxu0 %v2541_v38  ;;  %v3402_v17 = vld [vmem:[%s4241_s0 + $0xc8] sm:$0xff]  ;;  %v2739_v19 = vpack.c.bf16 %v403_v15, %v400_v13  ;;  %v375_v23 = vld [vmem:[#allocation5 + $0x278] sm:$0xff]  ;;  %v378_v25 = vld [vmem:[#allocation5 + $0x290] sm:$0xff] }
  0x95   :  { %2734 = vmatprep.subr.bf16.mxu1 %v2733_v62  ;;  %v368_v18 = vld [vmem:[#allocation5 + $0x240] sm:$0xff]  ;;  %v457_v24 = vld [vmem:[#allocation5 + $0x508] sm:$0xff]  ;;  %v406_v27 = vld [vmem:[#allocation5 + $0x370] sm:$0xff]  ;;  %v2561_v36 = vpack.c.bf16 %v378_v25, %v375_v23 }
  0x96   :  { %v2741_v26 = vpack.c.bf16 %v457_v24, %v454_v20  ;;  %v409_v28 = vld [vmem:[#allocation5 + $0x388] sm:$0xff]  ;;  %v3408_v29 = vld [vmem:[%s4241_s0 + $0xc0] sm:$0xff]  ;;  %v3413_v30 = vld [vmem:[%s4241_s0 + $0xf8] sm:$0xff]  ;;  %v2559_v32 = vpack.c.bf16 %v371_v22, %v368_v18 }
  0x97   :  { %1148 = vmatmul.mubr.f32.vlgmr.msra.gmra.mrb[0].mxu1 %v3361_v43  ;;  %2544 = vmatpush1.bf16.msra.mxu0 %v2543_v44  ;;  %v2743_v31 = vpack.c.bf16 %v409_v28, %v406_v27  ;;  %v374_v33 = vld [vmem:[#allocation5 + $0x270] sm:$0xff]  ;;  %v460_v34 = vld [vmem:[#allocation5 + $0x520] sm:$0xff]  ;;  %v463_v35 = vld [vmem:[#allocation5 + $0x538] sm:$0xff] }
  0x98   :  { %1152 = vmatprep.mubr.f32.mxu1 %v3366_v45  ;;  %2546 = vmatprep.subr.bf16.mxu0 %v2545_v46  ;;  %v377_v37 = vld [vmem:[#allocation5 + $0x288] sm:$0xff]  ;;  %v2745_v38 = vpack.c.bf16 %v463_v35, %v460_v34  ;;  %v412_v39 = vld [vmem:[#allocation5 + $0x3a0] sm:$0xff]  ;;  %v415_v40 = vld [vmem:[#allocation5 + $0x3b8] sm:$0xff] }
  0x99   :  { %2736 = vmatpush3.bf16.msra.mxu1 %v2735_v0  ;;  %v381_v41 = vld [vmem:[#allocation5 + $0x2a8] sm:$0xff]  ;;  %v384_v42 = vld [vmem:[#allocation5 + $0x2c0] sm:$0xff]  ;;  %v2747_v44 = vpack.c.bf16 %v415_v40, %v412_v39  ;;  %v466_v46 = vld [vmem:[#allocation5 + $0x550] sm:$0xff]  ;;  %v2563_v49 = vpack.c.bf16 %v377_v37, %v374_v33 }
  0x9a   :  { %2738 = vmatprep.subr.bf16.mxu1 %v2737_v12  ;;  %v469_v47 = vld [vmem:[#allocation5 + $0x568] sm:$0xff]  ;;  %v418_v54 = vld [vmem:[#allocation5 + $0x3d0] sm:$0xff]  ;;  %v2565_v55 = vpack.c.bf16 %v384_v42, %v381_v41  ;;  %v383_v57 = vld [vmem:[#allocation5 + $0x2b8] sm:$0xff] }
  0x9b   :  { %1153 = vmatmul.mubr.f32.gmra.mrb[2].mxu1 %v3372_v51  ;;  %2548 = vmatpush1.bf16.msra.mxu0 %v2547_v52  ;;  %v3421_v48 = vld [vmem:[%s4241_s0 + $0xf0] sm:$0xff]  ;;  %v3426_v50 = vld [vmem:[%s4241_s0 + $0x128] sm:$0xff]  ;;  %v2749_v52 = vpack.c.bf16 %v469_v47, %v466_v46  ;;  %v387_v59 = vld [vmem:[#allocation5 + $0x2d8] sm:$0xff] }
  0x9c   :  { %1157 = vmatprep.mubr.f32.mxu1 %v3378_v53  ;;  %2550 = vmatprep.subr.bf16.mxu0 %v2549_v56  ;;  %v380_v56 = vld [vmem:[#allocation5 + $0x2a0] sm:$0xff]  ;;  %v421_v58 = vld [vmem:[#allocation5 + $0x3e8] sm:$0xff]  ;;  %v390_v60 = vld [vmem:[#allocation5 + $0x2f0] sm:$0xff] }
  0x9d   :  { %2740 = vmatpush3.bf16.msra.mxu1 %v2739_v19  ;;  %v2751_v61 = vpack.c.bf16 %v421_v58, %v418_v54  ;;  %v472_v62 = vld [vmem:[#allocation5 + $0x580] sm:$0xff]  ;;  %v475_v0 = vld [vmem:[#allocation5 + $0x598] sm:$0xff]  ;;  %v2569_v9 = vpack.c.bf16 %v390_v60, %v387_v59  ;;  %v386_v10 = vld [vmem:[#allocation5 + $0x2d0] sm:$0xff] }
  0x9e   :  { %2742 = vmatprep.subr.bf16.mxu1 %v2741_v26  ;;  %v3432_v63 = vld [vmem:[%s4241_s0 + $0x120] sm:$0xff]  ;;  %v3438_v5 = vld [vmem:[%s4241_s0 + $0x158] sm:$0xff]  ;;  %v389_v11 = vld [vmem:[#allocation5 + $0x2e8] sm:$0xff] }
  0x9f   :  { %1158 = vmatmul.mubr.f32.gmra.mrb[4].mxu1 %v3385_v2  ;;  %2552 = vmatpush1.bf16.msra.mxu0 %v2551_v3  ;;  %v2567_v3 = vpack.c.bf16 %v383_v57, %v380_v56  ;;  %v424_v7 = vld [vmem:[#allocation5 + $0x400] sm:$0xff]  ;;  %v427_v8 = vld [vmem:[#allocation5 + $0x418] sm:$0xff]  ;;  %v393_v12 = vld [vmem:[#allocation5 + $0x308] sm:$0xff]  ;;  %v2571_v23 = vpack.c.bf16 %v389_v11, %v386_v10 }
  0xa0   :  { %1162 = vmatprep.mubr.f32.mxu1 %v3390_v4  ;;  %2554 = vmatprep.subr.bf16.mxu0 %v2553_v6  ;;  %v2753_v6 = vpack.c.bf16 %v475_v0, %v472_v62  ;;  %v396_v13 = vld [vmem:[#allocation5 + $0x320] sm:$0xff]  ;;  %v2755_v15 = vpack.c.bf16 %v427_v8, %v424_v7  ;;  %v481_v18 = vld [vmem:[#allocation5 + $0x5c8] sm:$0xff]  ;;  %v430_v20 = vld [vmem:[#allocation5 + $0x430] sm:$0xff] }
  0xa1   :  { %2744 = vmatpush3.bf16.msra.mxu1 %v2743_v31  ;;  %v3445_v22 = vld [vmem:[%s4241_s0 + $0x150] sm:$0xff]  ;;  %v3450_v24 = vld [vmem:[%s4241_s0 + $0x188] sm:$0xff]  ;;  %v2573_v25 = vpack.c.bf16 %v396_v13, %v393_v12  ;;  %v395_v27 = vld [vmem:[#allocation5 + $0x318] sm:$0xff] }
  0xa2   :  { %2746 = vmatprep.subr.bf16.mxu1 %v2745_v38  ;;  %v392_v26 = vld [vmem:[#allocation5 + $0x300] sm:$0xff]  ;;  %v399_v28 = vld [vmem:[#allocation5 + $0x338] sm:$0xff]  ;;  %v402_v31 = vld [vmem:[#allocation5 + $0x350] sm:$0xff] }
  0xa3   :  { %1163 = vmatmul.mubr.f32.gmra.mrb[6].mxu1 %v3396_v14  ;;  %2556 = vmatpush1.bf16.msra.mxu0 %v2555_v16  ;;  %v478_v16 = vld [vmem:[#allocation5 + $0x5b0] sm:$0xff]  ;;  %v484_v33 = vld [vmem:[#allocation5 + $0x5e0] sm:$0xff]  ;;  %v487_v34 = vld [vmem:[#allocation5 + $0x5f8] sm:$0xff]  ;;  %v2577_v37 = vpack.c.bf16 %v402_v31, %v399_v28 }
  0xa4   :  { %1167 = vmatprep.mubr.f32.mxu1 %v3402_v17  ;;  %2558 = vmatprep.subr.bf16.mxu0 %v2557_v21  ;;  %v2757_v19 = vpack.c.bf16 %v481_v18, %v478_v16  ;;  %v433_v21 = vld [vmem:[#allocation5 + $0x448] sm:$0xff]  ;;  %v3457_v35 = vld [vmem:[%s4241_s0 + $0x180] sm:$0xff]  ;;  %v398_v38 = vld [vmem:[#allocation5 + $0x330] sm:$0xff] }
  0xa5   :  { %2748 = vmatpush3.bf16.msra.mxu1 %v2747_v44  ;;  %v401_v39 = vld [vmem:[#allocation5 + $0x348] sm:$0xff]  ;;  %v3462_v40 = vld [vmem:[%s4241_s0 + $0x1b8] sm:$0xff]  ;;  %v408_v42 = vld [vmem:[#allocation5 + $0x380] sm:$0xff]  ;;  %v2761_v44 = vpack.c.bf16 %v487_v34, %v484_v33 }
  0xa6   :  { %2750 = vmatprep.subr.bf16.mxu1 %v2749_v52  ;;  %v405_v41 = vld [vmem:[#allocation5 + $0x368] sm:$0xff]  ;;  %v436_v46 = vld [vmem:[#allocation5 + $0x460] sm:$0xff]  ;;  %v439_v47 = vld [vmem:[#allocation5 + $0x478] sm:$0xff]  ;;  %v2579_v52 = vpack.c.bf16 %v401_v39, %v398_v38 }
  0xa7   :  { %1168 = vmatmul.mubr.f32.gmra.mrb[8].mxu1 %v3408_v29  ;;  %2560 = vmatpush1.bf16.msra.mxu0 %v2559_v32  ;;  %v2759_v32 = vpack.c.bf16 %v433_v21, %v430_v20  ;;  %v2581_v54 = vpack.c.bf16 %v408_v42, %v405_v41  ;;  %v407_v56 = vld [vmem:[#allocation5 + $0x378] sm:$0xff]  ;;  %v414_v58 = vld [vmem:[#allocation5 + $0x3b0] sm:$0xff]  ;;  %v413_v0 = vld [vmem:[#allocation5 + $0x3a8] sm:$0xff] }
  0xa8   :  { %1172 = vmatprep.mubr.f32.mxu1 %v3413_v30  ;;  %2562 = vmatprep.subr.bf16.mxu0 %v2561_v36  ;;  %v2575_v36 = vpack.c.bf16 %v395_v27, %v392_v26  ;;  %v411_v57 = vld [vmem:[#allocation5 + $0x398] sm:$0xff]  ;;  %v410_v62 = vld [vmem:[#allocation5 + $0x390] sm:$0xff]  ;;  %v541_v13 = vld [vmem:[#allocation5 + $0x7a8] sm:$0xff] }
  0xa9   :  { %2752 = vmatpush3.bf16.msra.mxu1 %v2751_v61  ;;  %v3484_v59 = vld [vmem:[%s4241_s0 + $0x1e0] sm:$0xff]  ;;  %v2585_v61 = vpack.c.bf16 %v414_v58, %v411_v57  ;;  %v2587_v7 = vpack.c.bf16 %v413_v0, %v410_v62  ;;  %v426_v12 = vld [vmem:[#allocation5 + $0x410] sm:$0xff]  ;;  %v437_v38 = vld [vmem:[#allocation5 + $0x468] sm:$0xff] }
  0xaa   :  { %2754 = vmatprep.subr.bf16.mxu1 %v2753_v6  ;;  %v420_v6 = vld [vmem:[#allocation5 + $0x3e0] sm:$0xff]  ;;  %v419_v10 = vld [vmem:[#allocation5 + $0x3d8] sm:$0xff]  ;;  %v422_v20 = vld [vmem:[#allocation5 + $0x3f0] sm:$0xff] }
  0xab   :  { %1173 = vmatmul.mubr.f32.gmra.mrb[10].mxu1 %v3421_v48  ;;  %2564 = vmatpush1.bf16.msra.mxu0 %v2563_v49  ;;  %v3470_v49 = vld [vmem:[%s4241_s0 + $0x1b0] sm:$0xff]  ;;  %v423_v11 = vld [vmem:[#allocation5 + $0x3f8] sm:$0xff]  ;;  %v428_v28 = vld [vmem:[#allocation5 + $0x420] sm:$0xff] }
  0xac   :  { %1177 = vmatprep.mubr.f32.mxu1 %v3426_v50  ;;  %2566 = vmatprep.subr.bf16.mxu0 %v2565_v55  ;;  %v404_v55 = vld [vmem:[#allocation5 + $0x360] sm:$0xff]  ;;  %v3518_v21 = vld [vmem:[%s4241_s0 + $0x278] sm:$0xff]  ;;  %v441_v39 = vld [vmem:[#allocation5 + $0x488] sm:$0xff] }
  0xad   :  { %2756 = vmatpush3.bf16.msra.mxu1 %v2755_v15  ;;  %v2583_v60 = vpack.c.bf16 %v407_v56, %v404_v55  ;;  %v3512_v15 = vld [vmem:[%s4241_s0 + $0x240] sm:$0xff]  ;;  %v438_v33 = vld [vmem:[#allocation5 + $0x470] sm:$0xff]  ;;  %v493_v55 = vld [vmem:[#allocation5 + $0x628] sm:$0xff] }
  0xae   :  { %2758 = vmatprep.subr.bf16.mxu1 %v2757_v19  ;;  %v2593_v19 = vpack.c.bf16 %v426_v12, %v423_v11  ;;  %v431_v31 = vld [vmem:[#allocation5 + $0x438] sm:$0xff]  ;;  %v444_v41 = vld [vmem:[#allocation5 + $0x4a0] sm:$0xff]  ;;  %v3568_v56 = vld [vmem:[%s4241_s0 + $0x10] sm:$0xff] }
  0xaf   :  { %1178 = vmatmul.mubr.f32.gmra.mrb[12].mxu1 %v3432_v63  ;;  %2568 = vmatpush1.bf16.msra.mxu0 %v2567_v3  ;;  %v417_v3 = vld [vmem:[#allocation5 + $0x3c8] sm:$0xff]  ;;  %v2599_v34 = vpack.c.bf16 %v431_v31, %v428_v28  ;;  %v456_v62 = vld [vmem:[#allocation5 + $0x500] sm:$0xff]  ;;  %v459_v11 = vld [vmem:[#allocation5 + $0x518] sm:$0xff] }
  0xb0   :  { %1182 = vmatprep.mubr.f32.mxu1 %v3438_v5  ;;  %2570 = vmatprep.subr.bf16.mxu0 %v2569_v9  ;;  %v2589_v8 = vpack.c.bf16 %v420_v6, %v417_v3  ;;  %v416_v9 = vld [vmem:[#allocation5 + $0x3c0] sm:$0xff]  ;;  %v547_v3 = vld [vmem:[#allocation5 + $0x7d8] sm:$0xff]  ;;  %v462_v12 = vld [vmem:[#allocation5 + $0x530] sm:$0xff] }
  0xb1   :  { %2760 = vmatpush3.bf16.msra.mxu1 %v2759_v32  ;;  %v2591_v16 = vpack.c.bf16 %v419_v10, %v416_v9  ;;  %v435_v32 = vld [vmem:[#allocation5 + $0x458] sm:$0xff]  ;;  %v544_v0 = vld [vmem:[#allocation5 + $0x7c0] sm:$0xff] }
  0xb2   :  { %2762 = vmatprep.subr.bf16.mxu1 %v2761_v44  ;;  %v2605_v44 = vpack.c.bf16 %v444_v41, %v441_v39  ;;  %v3582_v6 = vld [vmem:[%s4241_s0 + $0x40] sm:$0xff]  ;;  %v505_v39 = vld [vmem:[#allocation5 + $0x688] sm:$0xff] }
  0xb3   :  { %1183 = vmatmul.mubr.f32.gmra.mrb[14].mxu1 %v3445_v22  ;;  %2572 = vmatpush1.bf16.msra.mxu0 %v2571_v23  ;;  %v429_v23 = vld [vmem:[#allocation5 + $0x428] sm:$0xff]  ;;  %v452_v9 = vld [vmem:[#allocation5 + $0x4e0] sm:$0xff]  ;;  %v455_v10 = vld [vmem:[#allocation5 + $0x4f8] sm:$0xff] }
  0xb4   :  { %1187 = vmatprep.mubr.f32.mxu1 %v3450_v24  ;;  %2574 = vmatprep.subr.bf16.mxu0 %v2573_v25  ;;  %v3526_v25 = vld [vmem:[%s4241_s0 + $0x270] sm:$0xff]  ;;  %v3610_v28 = vld [vmem:[%s4241_s0 + $0xa0] sm:$0xff] }
  0xb5   :  { %v3624_v41 = vld [vmem:[%s4241_s0 + $0xd0] sm:$0xff] }
  0xb6   :  { %665 = vmatmul.mubr.f32.vlgmr.msra.gmra.mrb[0].mxu0 %v3361_v43  ;;  %v3476_v43 = vld [vmem:[%s4241_s0 + $0x1e8] sm:$0xff] }
  0xb7   :  { %1188 = vmatmul.mubr.f32.gmra.mrb[16].mxu1 %v3457_v35  ;;  %2576 = vmatpush1.bf16.msra.mxu0 %v2575_v36  ;;  %v2601_v36 = vpack.c.bf16 %v438_v33, %v435_v32  ;;  %v464_v33 = vld [vmem:[#allocation5 + $0x540] sm:$0xff] }
  0xb8   :  { %670 = vmatprep.mubr.f32.mxu0 %v3366_v45  ;;  %1192 = vmatprep.mubr.f32.mxu1 %v3462_v40  ;;  %v2763_v45 = vpack.c.bf16 %v439_v47, %v436_v46  ;;  %v440_v46 = vld [vmem:[#allocation5 + $0x480] sm:$0xff]  ;;  %v443_v47 = vld [vmem:[#allocation5 + $0x498] sm:$0xff] }
  0xb9   :  { %2578 = vmatprep.subr.bf16.mxu0 %v2577_v37  ;;  %v434_v37 = vld [vmem:[#allocation5 + $0x450] sm:$0xff]  ;;  %v2607_v57 = vpack.c.bf16 %v443_v47, %v440_v46  ;;  %v473_v47 = vld [vmem:[#allocation5 + $0x588] sm:$0xff] }
  0xba   :  { %671 = vmatmul.mubr.f32.gmra.mrb[2].mxu0 %v3372_v51  ;;  %v3490_v51 = vld [vmem:[%s4241_s0 + $0x218] sm:$0xff]  ;;  %2764 = vmatpush3.bf16.msra.mxu1 %v2763_v45  ;;  %v2603_v42 = vpack.c.bf16 %v437_v38, %v434_v37 }
  0xbb   :  { %1193 = vmatmul.mubr.f32.gmra.mrb[18].mxu1 %v3470_v49  ;;  %2580 = vmatpush1.bf16.msra.mxu0 %v2579_v52  ;;  %v447_v52 = vld [vmem:[#allocation5 + $0x4b8] sm:$0xff]  ;;  %v446_v45 = vld [vmem:[#allocation5 + $0x4b0] sm:$0xff] }
  0xbc   :  { %676 = vmatprep.mubr.f32.mxu0 %v3378_v53  ;;  %1197 = vmatprep.mubr.f32.mxu1 %v3476_v43  ;;  %v3498_v53 = vld [vmem:[%s4241_s0 + $0x210] sm:$0xff] }
  0xbd   :  { %2582 = vmatprep.subr.bf16.mxu0 %v2581_v54  ;;  %v450_v54 = vld [vmem:[#allocation5 + $0x4d0] sm:$0xff] }
  0xbe   :  { %677 = vmatmul.mubr.f32.gmra.mrb[4].mxu0 %v3385_v2  ;;  %v3504_v2 = vld [vmem:[%s4241_s0 + $0x248] sm:$0xff]  ;;  %v2609_v58 = vpack.c.bf16 %v450_v54, %v447_v52  ;;  %v474_v37 = vld [vmem:[#allocation5 + $0x590] sm:$0xff] }
  0xbf   :  { %1198 = vmatmul.mubr.f32.gmra.mrb[20].mxu1 %v3484_v59  ;;  %2584 = vmatpush1.bf16.msra.mxu0 %v2583_v60  ;;  %v449_v60 = vld [vmem:[#allocation5 + $0x4c8] sm:$0xff]  ;;  %v502_v38 = vld [vmem:[#allocation5 + $0x670] sm:$0xff]  ;;  %v480_v54 = vld [vmem:[#allocation5 + $0x5c0] sm:$0xff] }
  0xc0   :  { %682 = vmatprep.mubr.f32.mxu0 %v3390_v4  ;;  %1202 = vmatprep.mubr.f32.mxu1 %v3490_v51  ;;  %v538_v4 = vld [vmem:[#allocation5 + $0x790] sm:$0xff]  ;;  %v477_v52 = vld [vmem:[#allocation5 + $0x5a8] sm:$0xff] }
  0xc1   :  { %2586 = vmatprep.subr.bf16.mxu0 %v2585_v61  ;;  %v2765_v18 = vpack.c.bf16 %v541_v13, %v538_v4  ;;  %v453_v61 = vld [vmem:[#allocation5 + $0x4e8] sm:$0xff]  ;;  %v496_v4 = vld [vmem:[#allocation5 + $0x640] sm:$0xff]  ;;  %v499_v13 = vld [vmem:[#allocation5 + $0x658] sm:$0xff] }
  0xc2   :  { %683 = vmatmul.mubr.f32.gmra.mrb[6].mxu0 %v3396_v14  ;;  %v425_v14 = vld [vmem:[#allocation5 + $0x408] sm:$0xff]  ;;  %v470_v46 = vld [vmem:[#allocation5 + $0x570] sm:$0xff] }
  0xc3   :  { %1203 = vmatmul.mubr.f32.gmra.mrb[22].mxu1 %v3498_v53  ;;  %2588 = vmatpush1.bf16.msra.mxu0 %v2587_v7  ;;  %v2595_v26 = vpack.c.bf16 %v425_v14, %v422_v20  ;;  %v2611_v7 = vpack.c.bf16 %v449_v60, %v446_v45  ;;  %v458_v20 = vld [vmem:[#allocation5 + $0x510] sm:$0xff]  ;;  %v461_v14 = vld [vmem:[#allocation5 + $0x528] sm:$0xff]  ;;  %v2629_v45 = vpack.c.bf16 %v480_v54, %v477_v52  ;;  %v476_v60 = vld [vmem:[#allocation5 + $0x5a0] sm:$0xff] }
  0xc4   :  { %688 = vmatprep.mubr.f32.mxu0 %v3402_v17  ;;  %1207 = vmatprep.mubr.f32.mxu1 %v3504_v2  ;;  %v432_v17 = vld [vmem:[#allocation5 + $0x440] sm:$0xff]  ;;  %v2619_v31 = vpack.c.bf16 %v461_v14, %v458_v20  ;;  %v503_v52 = vld [vmem:[#allocation5 + $0x678] sm:$0xff] }
  0xc5   :  { %2590 = vmatprep.subr.bf16.mxu0 %v2589_v8  ;;  %2766 = vmatprep.subr.bf16.mxu1 %v2765_v18  ;;  %v2597_v27 = vpack.c.bf16 %v432_v17, %v429_v23  ;;  %v2613_v8 = vpack.c.bf16 %v456_v62, %v453_v61  ;;  %v2615_v18 = vpack.c.bf16 %v455_v10, %v452_v9  ;;  %v465_v23 = vld [vmem:[#allocation5 + $0x548] sm:$0xff]  ;;  %v468_v17 = vld [vmem:[#allocation5 + $0x560] sm:$0xff]  ;;  %v479_v61 = vld [vmem:[#allocation5 + $0x5b8] sm:$0xff] }
  0xc6   :  { %689 = vmatmul.mubr.f32.gmra.mrb[8].mxu0 %v3408_v29  ;;  %v3532_v29 = vld [vmem:[%s4241_s0 + $0x2a8] sm:$0xff]  ;;  %v2621_v32 = vpack.c.bf16 %v468_v17, %v465_v23  ;;  %v483_v62 = vld [vmem:[#allocation5 + $0x5d8] sm:$0xff]  ;;  %v482_v10 = vld [vmem:[#allocation5 + $0x5d0] sm:$0xff] }
  0xc7   :  { %1208 = vmatmul.mubr.f32.gmra.mrb[24].mxu1 %v3512_v15  ;;  %2592 = vmatpush1.bf16.msra.mxu0 %v2591_v16  ;;  %v3596_v16 = vld [vmem:[%s4241_s0 + $0x70] sm:$0xff]  ;;  %v488_v14 = vld [vmem:[#allocation5 + $0x600] sm:$0xff]  ;;  %v491_v23 = vld [vmem:[#allocation5 + $0x618] sm:$0xff] }
  0xc8   :  { %694 = vmatprep.mubr.f32.mxu0 %v3413_v30  ;;  %1212 = vmatprep.mubr.f32.mxu1 %v3518_v21  ;;  %v3540_v30 = vld [vmem:[%s4241_s0 + $0x2a0] sm:$0xff] }
  0xc9   :  { %2594 = vmatprep.subr.bf16.mxu0 %v2593_v19  ;;  %v2617_v19 = vpack.c.bf16 %v462_v12, %v459_v11  ;;  %v485_v11 = vld [vmem:[#allocation5 + $0x5e8] sm:$0xff]  ;;  %v495_v17 = vld [vmem:[#allocation5 + $0x638] sm:$0xff] }
  0xca   :  { %695 = vmatmul.mubr.f32.gmra.mrb[10].mxu0 %v3421_v48  ;;  %v3546_v48 = vld [vmem:[%s4241_s0 + $0x2d8] sm:$0xff]  ;;  %v489_v12 = vld [vmem:[#allocation5 + $0x608] sm:$0xff] }
  0xcb   :  { %1213 = vmatmul.mubr.f32.gmra.mrb[26].mxu1 %v3526_v25  ;;  %2596 = vmatpush1.bf16.msra.mxu0 %v2595_v26  ;;  %v550_v26 = vld [vmem:[#allocation5 + $0x7f0] sm:$0xff]  ;;  %v507_v54 = vld [vmem:[#allocation5 + $0x698] sm:$0xff] }
  0xcc   :  { %700 = vmatprep.mubr.f32.mxu0 %v3426_v50  ;;  %1217 = vmatprep.mubr.f32.mxu1 %v3532_v29  ;;  %v3554_v50 = vld [vmem:[%s4241_s0 + $0x2d0] sm:$0xff] }
  0xcd   :  { %2598 = vmatprep.subr.bf16.mxu0 %v2597_v27  ;;  %v553_v27 = vld [vmem:[#allocation5 + $0x808] sm:$0xff] }
  0xce   :  { %701 = vmatmul.mubr.f32.gmra.mrb[12].mxu0 %v3432_v63  ;;  %v3560_v63 = vld [vmem:[%s4241_s0 + $0x18] sm:$0xff] }
  0xcf   :  { %1218 = vmatmul.mubr.f32.gmra.mrb[28].mxu1 %v3540_v30  ;;  %2600 = vmatpush1.bf16.msra.mxu0 %v2599_v34  ;;  %v467_v34 = vld [vmem:[#allocation5 + $0x558] sm:$0xff] }
  0xd0   :  { %706 = vmatprep.mubr.f32.mxu0 %v3438_v5  ;;  %1222 = vmatprep.mubr.f32.mxu1 %v3546_v48  ;;  %v490_v5 = vld [vmem:[#allocation5 + $0x610] sm:$0xff] }
  0xd1   :  { %2602 = vmatprep.subr.bf16.mxu0 %v2601_v36  ;;  %v471_v36 = vld [vmem:[#allocation5 + $0x578] sm:$0xff] }
  0xd2   :  { %707 = vmatmul.mubr.f32.gmra.mrb[14].mxu0 %v3445_v22  ;;  %v3574_v22 = vld [vmem:[%s4241_s0 + $0x48] sm:$0xff] }
  0xd3   :  { %1223 = vmatmul.mubr.f32.gmra.mrb[30].mxu1 %v3554_v50  ;;  %2604 = vmatpush1.bf16.msra.mxu0 %v2603_v42  ;;  %v2623_v42 = vpack.c.bf16 %v467_v34, %v464_v33  ;;  %v494_v34 = vld [vmem:[#allocation5 + $0x630] sm:$0xff] }
  0xd4   :  { %712 = vmatprep.mubr.f32.mxu0 %v3450_v24  ;;  %1292 = vmatprep.mubr.f32.mxu1 %v3560_v63  ;;  %v2767_v24 = vpack.c.bf16 %v493_v55, %v490_v5  ;;  %v556_v5 = vld [vmem:[#allocation5 + $0x820] sm:$0xff]  ;;  %v559_v55 = vld [vmem:[#allocation5 + $0x838] sm:$0xff] }
  0xd5   :  { %2606 = vmatprep.subr.bf16.mxu0 %v2605_v44  ;;  %v2625_v44 = vpack.c.bf16 %v474_v37, %v471_v36  ;;  %v497_v36 = vld [vmem:[#allocation5 + $0x648] sm:$0xff] }
  0xd6   :  { %713 = vmatmul.mubr.f32.gmra.mrb[16].mxu0 %v3457_v35  ;;  %v3588_v35 = vld [vmem:[%s4241_s0 + $0x78] sm:$0xff]  ;;  %v501_v37 = vld [vmem:[#allocation5 + $0x668] sm:$0xff] }
  0xd7   :  { %1293 = vmatmul.mubr.f32.vlgmr.msra.gmra.mrb[32].mxu1 %v3568_v56  ;;  %2608 = vmatpush1.bf16.msra.mxu0 %v2607_v57  ;;  %v3638_v57 = vld [vmem:[%s4241_s0 + $0x100] sm:$0xff] }
  0xd8   :  { %718 = vmatprep.mubr.f32.mxu0 %v3462_v40  ;;  %1297 = vmatprep.mubr.f32.mxu1 %v3574_v22  ;;  %v2769_v40 = vpack.c.bf16 %v547_v3, %v544_v0  ;;  %v508_v0 = vld [vmem:[#allocation5 + $0x6a0] sm:$0xff]  ;;  %v511_v3 = vld [vmem:[#allocation5 + $0x6b8] sm:$0xff] }
  0xd9   :  { %2610 = vmatprep.subr.bf16.mxu0 %v2609_v58  ;;  %2768 = vmatpush3.bf16.msra.mxu1 %v2767_v24  ;;  %v2627_v58 = vpack.c.bf16 %v473_v47, %v470_v46  ;;  %v486_v24 = vld [vmem:[#allocation5 + $0x5f0] sm:$0xff]  ;;  %v500_v47 = vld [vmem:[#allocation5 + $0x660] sm:$0xff] }
  0xda   :  { %719 = vmatmul.mubr.f32.gmra.mrb[18].mxu0 %v3470_v49  ;;  %v3602_v49 = vld [vmem:[%s4241_s0 + $0xa8] sm:$0xff]  ;;  %2770 = vmatprep.subr.bf16.mxu1 %v2769_v40  ;;  %v2633_v9 = vpack.c.bf16 %v486_v24, %v483_v62 }
  0xdb   :  { %1298 = vmatmul.mubr.f32.gmra.mrb[34].mxu1 %v3582_v6  ;;  %2612 = vmatpush1.bf16.msra.mxu0 %v2611_v7  ;;  %v3652_v7 = vld [vmem:[%s4241_s0 + $0x130] sm:$0xff]  ;;  %v492_v40 = vld [vmem:[#allocation5 + $0x620] sm:$0xff] }
  0xdc   :  { %724 = vmatprep.mubr.f32.mxu0 %v3476_v43  ;;  %1302 = vmatprep.mubr.f32.mxu1 %v3588_v35  ;;  %v2771_v43 = vpack.c.bf16 %v499_v13, %v496_v4  ;;  %v562_v4 = vld [vmem:[#allocation5 + $0x850] sm:$0xff]  ;;  %v565_v13 = vld [vmem:[#allocation5 + $0x868] sm:$0xff]  ;;  %v2637_v20 = vpack.c.bf16 %v492_v40, %v489_v12  ;;  %v515_v12 = vld [vmem:[#allocation5 + $0x6d8] sm:$0xff] }
  0xdd   :  { %2614 = vmatprep.subr.bf16.mxu0 %v2613_v8  ;;  %v2631_v8 = vpack.c.bf16 %v479_v61, %v476_v60  ;;  %v506_v61 = vld [vmem:[#allocation5 + $0x690] sm:$0xff]  ;;  %v509_v62 = vld [vmem:[#allocation5 + $0x6a8] sm:$0xff]  ;;  %v519_v40 = vld [vmem:[#allocation5 + $0x6f8] sm:$0xff] }
  0xde   :  { %725 = vmatmul.mubr.f32.gmra.mrb[20].mxu0 %v3484_v59  ;;  %v3616_v59 = vld [vmem:[%s4241_s0 + $0xd8] sm:$0xff]  ;;  %2772 = vmatpush3.bf16.msra.mxu1 %v2771_v43  ;;  %v513_v24 = vld [vmem:[#allocation5 + $0x6c8] sm:$0xff] }
  0xdf   :  { %1303 = vmatmul.mubr.f32.gmra.mrb[36].mxu1 %v3596_v16  ;;  %2616 = vmatpush1.bf16.msra.mxu0 %v2615_v18  ;;  %v3666_v18 = vld [vmem:[%s4241_s0 + $0x160] sm:$0xff]  ;;  %v498_v43 = vld [vmem:[#allocation5 + $0x650] sm:$0xff] }
  0xe0   :  { %730 = vmatprep.mubr.f32.mxu0 %v3490_v51  ;;  %1307 = vmatprep.mubr.f32.mxu1 %v3602_v49  ;;  %v2773_v51 = vpack.c.bf16 %v553_v27, %v550_v26  ;;  %v514_v26 = vld [vmem:[#allocation5 + $0x6d0] sm:$0xff]  ;;  %v517_v27 = vld [vmem:[#allocation5 + $0x6e8] sm:$0xff]  ;;  %v2641_v33 = vpack.c.bf16 %v498_v43, %v495_v17 }
  0xe1   :  { %2618 = vmatprep.subr.bf16.mxu0 %v2617_v19  ;;  %v2635_v19 = vpack.c.bf16 %v485_v11, %v482_v10  ;;  %v512_v11 = vld [vmem:[#allocation5 + $0x6c0] sm:$0xff]  ;;  %v521_v17 = vld [vmem:[#allocation5 + $0x708] sm:$0xff] }
  0xe2   :  { %731 = vmatmul.mubr.f32.gmra.mrb[22].mxu0 %v3498_v53  ;;  %v3630_v53 = vld [vmem:[%s4241_s0 + $0x108] sm:$0xff]  ;;  %2774 = vmatprep.subr.bf16.mxu1 %v2773_v51 }
  0xe3   :  { %1308 = vmatmul.mubr.f32.gmra.mrb[38].mxu1 %v3610_v28  ;;  %2620 = vmatpush1.bf16.msra.mxu0 %v2619_v31  ;;  %v3680_v31 = vld [vmem:[%s4241_s0 + $0x190] sm:$0xff]  ;;  %v504_v51 = vld [vmem:[#allocation5 + $0x680] sm:$0xff] }
  0xe4   :  { %736 = vmatprep.mubr.f32.mxu0 %v3504_v2  ;;  %1312 = vmatprep.mubr.f32.mxu1 %v3616_v59  ;;  %v2775_v2 = vpack.c.bf16 %v505_v39, %v502_v38  ;;  %v568_v38 = vld [vmem:[#allocation5 + $0x880] sm:$0xff]  ;;  %v571_v39 = vld [vmem:[#allocation5 + $0x898] sm:$0xff]  ;;  %v2645_v46 = vpack.c.bf16 %v504_v51, %v501_v37  ;;  %v525_v43 = vld [vmem:[#allocation5 + $0x728] sm:$0xff] }
  0xe5   :  { %2622 = vmatprep.subr.bf16.mxu0 %v2621_v32  ;;  %v2639_v32 = vpack.c.bf16 %v491_v23, %v488_v14  ;;  %v518_v23 = vld [vmem:[#allocation5 + $0x6f0] sm:$0xff]  ;;  %v527_v37 = vld [vmem:[#allocation5 + $0x738] sm:$0xff] }
  0xe6   :  { %737 = vmatmul.mubr.f32.gmra.mrb[24].mxu0 %v3512_v15  ;;  %v3644_v15 = vld [vmem:[%s4241_s0 + $0x138] sm:$0xff]  ;;  %2776 = vmatpush3.bf16.msra.mxu1 %v2775_v2 }
  0xe7   :  { %1313 = vmatmul.mubr.f32.gmra.mrb[40].mxu1 %v3624_v41  ;;  %2624 = vmatpush1.bf16.msra.mxu0 %v2623_v42  ;;  %v3694_v42 = vld [vmem:[%s4241_s0 + $0x1c0] sm:$0xff]  ;;  %v510_v2 = vld [vmem:[#allocation5 + $0x6b0] sm:$0xff] }
  0xe8   :  { %742 = vmatprep.mubr.f32.mxu0 %v3518_v21  ;;  %1317 = vmatprep.mubr.f32.mxu1 %v3630_v53  ;;  %v2777_v21 = vpack.c.bf16 %v559_v55, %v556_v5  ;;  %v520_v5 = vld [vmem:[#allocation5 + $0x700] sm:$0xff]  ;;  %v523_v55 = vld [vmem:[#allocation5 + $0x718] sm:$0xff]  ;;  %v2649_v60 = vpack.c.bf16 %v510_v2, %v507_v54  ;;  %v533_v54 = vld [vmem:[#allocation5 + $0x768] sm:$0xff] }
  0xe9   :  { %2626 = vmatprep.subr.bf16.mxu0 %v2625_v44  ;;  %v2643_v44 = vpack.c.bf16 %v497_v36, %v494_v34  ;;  %v524_v36 = vld [vmem:[#allocation5 + $0x720] sm:$0xff]  ;;  %v531_v51 = vld [vmem:[#allocation5 + $0x758] sm:$0xff] }
  0xea   :  { %743 = vmatmul.mubr.f32.gmra.mrb[26].mxu0 %v3526_v25  ;;  %v3658_v25 = vld [vmem:[%s4241_s0 + $0x168] sm:$0xff]  ;;  %2778 = vmatprep.subr.bf16.mxu1 %v2777_v21 }
  0xeb   :  { %1318 = vmatmul.mubr.f32.gmra.mrb[42].mxu1 %v3638_v57  ;;  %2628 = vmatpush1.bf16.msra.mxu0 %v2627_v58  ;;  %v3708_v58 = vld [vmem:[%s4241_s0 + $0x1f0] sm:$0xff]  ;;  %v516_v21 = vld [vmem:[#allocation5 + $0x6e0] sm:$0xff] }
  0xec   :  { %748 = vmatprep.mubr.f32.mxu0 %v3532_v29  ;;  %1322 = vmatprep.mubr.f32.mxu1 %v3644_v15  ;;  %v2779_v29 = vpack.c.bf16 %v511_v3, %v508_v0  ;;  %v574_v0 = vld [vmem:[#allocation5 + $0x8b0] sm:$0xff]  ;;  %v577_v3 = vld [vmem:[#allocation5 + $0x8c8] sm:$0xff]  ;;  %v2653_v10 = vpack.c.bf16 %v516_v21, %v513_v24  ;;  %v3792_v24 = vld [vmem:[%s4241_s0 + $0x20] sm:$0xff] }
  0xed   :  { %2630 = vmatprep.subr.bf16.mxu0 %v2629_v45  ;;  %v2647_v45 = vpack.c.bf16 %v503_v52, %v500_v47  ;;  %v530_v52 = vld [vmem:[#allocation5 + $0x750] sm:$0xff] }
  0xee   :  { %749 = vmatmul.mubr.f32.gmra.mrb[28].mxu0 %v3540_v30  ;;  %v3672_v30 = vld [vmem:[%s4241_s0 + $0x198] sm:$0xff]  ;;  %2780 = vmatpush3.bf16.msra.mxu1 %v2779_v29 }
  0xef   :  { %1323 = vmatmul.mubr.f32.gmra.mrb[44].mxu1 %v3652_v7  ;;  %2632 = vmatpush1.bf16.msra.mxu0 %v2631_v8  ;;  %v3722_v8 = vld [vmem:[%s4241_s0 + $0x220] sm:$0xff]  ;;  %v522_v29 = vld [vmem:[#allocation5 + $0x710] sm:$0xff] }
  0xf0   :  { %754 = vmatprep.mubr.f32.mxu0 %v3546_v48  ;;  %1327 = vmatprep.mubr.f32.mxu1 %v3658_v25  ;;  %v2781_v48 = vpack.c.bf16 %v565_v13, %v562_v4  ;;  %v526_v4 = vld [vmem:[#allocation5 + $0x730] sm:$0xff]  ;;  %v529_v13 = vld [vmem:[#allocation5 + $0x748] sm:$0xff]  ;;  %v2657_v14 = vpack.c.bf16 %v522_v29, %v519_v40  ;;  %v548_v40 = vld [vmem:[#allocation5 + $0x7e0] sm:$0xff] }
  0xf1   :  { %2634 = vmatprep.subr.bf16.mxu0 %v2633_v9  ;;  %v2651_v9 = vpack.c.bf16 %v509_v62, %v506_v61  ;;  %v539_v61 = vld [vmem:[#allocation5 + $0x798] sm:$0xff] }
  0xf2   :  { %755 = vmatmul.mubr.f32.gmra.mrb[30].mxu0 %v3554_v50  ;;  %v3686_v50 = vld [vmem:[%s4241_s0 + $0x1c8] sm:$0xff]  ;;  %2782 = vmatprep.subr.bf16.mxu1 %v2781_v48  ;;  %v543_v62 = vld [vmem:[#allocation5 + $0x7b8] sm:$0xff] }
  0xf3   :  { %1328 = vmatmul.mubr.f32.gmra.mrb[46].mxu1 %v3666_v18  ;;  %2636 = vmatpush1.bf16.msra.mxu0 %v2635_v19  ;;  %v3736_v19 = vld [vmem:[%s4241_s0 + $0x250] sm:$0xff]  ;;  %v528_v48 = vld [vmem:[#allocation5 + $0x740] sm:$0xff]  ;;  %v551_v29 = vld [vmem:[#allocation5 + $0x7f8] sm:$0xff] }
  0xf4   :  { %825 = vmatprep.mubr.f32.mxu0 %v3560_v63  ;;  %1332 = vmatprep.mubr.f32.mxu1 %v3672_v30  ;;  %v2783_v63 = vpack.c.bf16 %v517_v27, %v514_v26  ;;  %v580_v26 = vld [vmem:[#allocation5 + $0x8e0] sm:$0xff]  ;;  %v583_v27 = vld [vmem:[#allocation5 + $0x8f8] sm:$0xff]  ;;  %v2661_v34 = vpack.c.bf16 %v528_v48, %v525_v43 }
  0xf5   :  { %2638 = vmatprep.subr.bf16.mxu0 %v2637_v20  ;;  %v2655_v20 = vpack.c.bf16 %v515_v12, %v512_v11  ;;  %v564_v43 = vld [vmem:[#allocation5 + $0x860] sm:$0xff] }
  0xf6   :  { %826 = vmatmul.mubr.f32.vlgmr.msra.gmra.mrb[0].mxu0 %v3568_v56  ;;  %v3700_v56 = vld [vmem:[%s4241_s0 + $0x1f8] sm:$0xff]  ;;  %2784 = vmatpush3.bf16.msra.mxu1 %v2783_v63  ;;  %v2793_v63 = vpack.c.bf16 %v583_v27, %v580_v26  ;;  %v560_v26 = vld [vmem:[#allocation5 + $0x840] sm:$0xff] }
  0xf7   :  { %1333 = vmatmul.mubr.f32.gmra.mrb[48].mxu1 %v3680_v31  ;;  %2640 = vmatpush1.bf16.msra.mxu0 %v2639_v32  ;;  %v3750_v32 = vld [vmem:[%s4241_s0 + $0x280] sm:$0xff] }
  0xf8   :  { %831 = vmatprep.mubr.f32.mxu0 %v3574_v22  ;;  %1337 = vmatprep.mubr.f32.mxu1 %v3686_v50  ;;  %v2785_v22 = vpack.c.bf16 %v571_v39, %v568_v38  ;;  %v532_v38 = vld [vmem:[#allocation5 + $0x760] sm:$0xff]  ;;  %v535_v39 = vld [vmem:[#allocation5 + $0x778] sm:$0xff] }
  0xf9   :  { %2642 = vmatprep.subr.bf16.mxu0 %v2641_v33  ;;  %v2659_v33 = vpack.c.bf16 %v521_v17, %v518_v23  ;;  %v2795_v2 = vpack.c.bf16 %v535_v39, %v532_v38  ;;  %v557_v23 = vld [vmem:[#allocation5 + $0x828] sm:$0xff]  ;;  %v563_v27 = vld [vmem:[#allocation5 + $0x858] sm:$0xff]  ;;  %v576_v38 = vld [vmem:[#allocation5 + $0x8c0] sm:$0xff] }
  0xfa   :  { %832 = vmatmul.mubr.f32.gmra.mrb[2].mxu0 %v3582_v6  ;;  %v3714_v6 = vld [vmem:[%s4241_s0 + $0x228] sm:$0xff]  ;;  %2786 = vmatprep.subr.bf16.mxu1 %v2785_v22 }
  0xfb   :  { %1338 = vmatmul.mubr.f32.gmra.mrb[50].mxu1 %v3694_v42  ;;  %2644 = vmatpush1.bf16.msra.mxu0 %v2643_v44  ;;  %v3764_v44 = vld [vmem:[%s4241_s0 + $0x2b0] sm:$0xff]  ;;  %v540_v22 = vld [vmem:[#allocation5 + $0x7a0] sm:$0xff] }
  0xfc   :  { %837 = vmatprep.mubr.f32.mxu0 %v3588_v35  ;;  %1342 = vmatprep.mubr.f32.mxu1 %v3700_v56  ;;  %v2787_v35 = vpack.c.bf16 %v523_v55, %v520_v5  ;;  %v3778_v5 = vld [vmem:[%s4241_s0 + $0x2e0] sm:$0xff]  ;;  %v2667_v55 = vpack.c.bf16 %v533_v54, %v530_v52  ;;  %v561_v17 = vld [vmem:[#allocation5 + $0x848] sm:$0xff] }
  0xfd   :  { %2646 = vmatprep.subr.bf16.mxu0 %v2645_v46  ;;  %v2663_v46 = vpack.c.bf16 %v527_v37, %v524_v36  ;;  %v2687_v36 = vpack.c.bf16 %v563_v27, %v560_v26  ;;  %v575_v52 = vld [vmem:[#allocation5 + $0x8b8] sm:$0xff] }
  0xfe   :  { %838 = vmatmul.mubr.f32.gmra.mrb[4].mxu0 %v3596_v16  ;;  %v3728_v16 = vld [vmem:[%s4241_s0 + $0x258] sm:$0xff]  ;;  %2788 = vmatpush3.bf16.msra.mxu1 %v2787_v35 }
  0xff   :  { %1343 = vmatmul.mubr.f32.gmra.mrb[52].mxu1 %v3708_v58  ;;  %2648 = vmatpush1.bf16.msra.mxu0 %v2647_v45  ;;  %v579_v54 = vld [vmem:[#allocation5 + $0x8d8] sm:$0xff] }
 0x100   :  { %843 = vmatprep.mubr.f32.mxu0 %v3602_v49  ;;  %1347 = vmatprep.mubr.f32.mxu1 %v3714_v6  ;;  %v2789_v49 = vpack.c.bf16 %v577_v3, %v574_v0  ;;  %v542_v0 = vld [vmem:[#allocation5 + $0x7b0] sm:$0xff]  ;;  %v545_v3 = vld [vmem:[#allocation5 + $0x7c8] sm:$0xff] }
 0x101   :  { %2650 = vmatprep.subr.bf16.mxu0 %v2649_v60  ;;  %v536_v60 = vld [vmem:[#allocation5 + $0x780] sm:$0xff]  ;;  %v2675_v11 = vpack.c.bf16 %v545_v3, %v542_v0  ;;  %v283_v0 = vld [vmem:[%s4241_s0 + $0x298] sm:$0xff]  ;;  %v154_v3 = vlaneseq }
 0x102   :  { %844 = vmatmul.mubr.f32.gmra.mrb[6].mxu0 %v3610_v28  ;;  %v3742_v28 = vld [vmem:[%s4241_s0 + $0x288] sm:$0xff]  ;;  %2790 = vmatprep.subr.bf16.mxu1 %v2789_v49  ;;  %v2671_v21 = vpack.c.bf16 %v539_v61, %v536_v60  ;;  %v555_v49 = vld [vmem:[#allocation5 + $0x818] sm:$0xff] }
 0x103   :  { %1348 = vmatmul.mubr.f32.gmra.mrb[54].mxu1 %v3722_v8  ;;  %2652 = vmatpush1.bf16.msra.mxu0 %v2651_v9  ;;  %v549_v9 = vld [vmem:[#allocation5 + $0x7e8] sm:$0xff] }
 0x104   :  { %849 = vmatprep.mubr.f32.mxu0 %v3616_v59  ;;  %1352 = vmatprep.mubr.f32.mxu1 %v3728_v16  ;;  %v2791_v59 = vpack.c.bf16 %v529_v13, %v526_v4  ;;  %v558_v4 = vld [vmem:[#allocation5 + $0x830] sm:$0xff]  ;;  %v2679_v13 = vpack.c.bf16 %v551_v29, %v548_v40  ;;  %v253_v61 = vld [vmem:[%s4241_s0 + $0x1a8] sm:$0xff]  ;;  %v3197_v29 = vmov 1966171168  }
 0x105   :  { %2654 = vmatprep.subr.bf16.mxu0 %v2653_v10  ;;  %v552_v10 = vld [vmem:[#allocation5 + $0x800] sm:$0xff] }
 0x106   :  { %850 = vmatmul.mubr.f32.gmra.mrb[8].mxu0 %v3624_v41  ;;  %v3756_v41 = vld [vmem:[%s4241_s0 + $0x2b8] sm:$0xff]  ;;  %2792 = vmatpush3.bf16.msra.mxu1 %v2791_v59  ;;  %v2677_v12 = vpack.c.bf16 %v552_v10, %v549_v9  ;;  %v2685_v59 = vpack.c.bf16 %v564_v43, %v561_v17  ;;  %v289_v9 = vld [vmem:[%s4241_s0 + $0x2c8] sm:$0xff]  ;;  %v3939_v10 = vshrl.u32 %v154_v3, 7  ;;  %v3198_v17 = vmov 0.0  }
 0x107   :  { %1353 = vmatmul.mubr.f32.gmra.mrb[56].mxu1 %v3736_v19  ;;  %2656 = vmatpush1.bf16.msra.mxu0 %v2655_v20  ;;  %v2681_v20 = vpack.c.bf16 %v558_v4, %v555_v49  ;;  %v152_v49 = vld [vmem:[#allocation10] sm:$0x7]  ;;  %v294_v4 = vld [vmem:[%s4241_s0 + $0x2f0] sm:$0xff] }
 0x108   :  { %855 = vmatprep.mubr.f32.mxu0 %v3630_v53  ;;  %1357 = vmatprep.mubr.f32.mxu1 %v3742_v28  ;;  %v534_v53 = vld [vmem:[#allocation5 + $0x770] sm:$0xff]  ;;  %v160_v40 = vsub.s32 1, %v3939_v10  ;;  %v595_v27 = vsub.s32 2, %v3939_v10 }
 0x109   :  { %2658 = vmatprep.subr.bf16.mxu0 %v2657_v14  ;;  %v2665_v47 = vpack.c.bf16 %v534_v53, %v531_v51  ;;  %2794 = vmatprep.subr.bf16.mxu1 %v2793_v63  ;;  %v554_v14 = vld [vmem:[#allocation5 + $0x810] sm:$0xff]  ;;  %v569_v53 = vld [vmem:[#allocation5 + $0x888] sm:$0xff] }
 0x10a   :  { %856 = vmatmul.mubr.f32.gmra.mrb[10].mxu0 %v3638_v57  ;;  %v3770_v57 = vld [vmem:[%s4241_s0 + $0x2e8] sm:$0xff]  ;;  %2796 = vmatpush3.bf16.msra.mxu1 %v2795_v2  ;;  %v2683_v48 = vpack.c.bf16 %v557_v23, %v554_v14  ;;  %v566_v51 = vld [vmem:[#allocation5 + $0x870] sm:$0xff] }
 0x10b   :  { %1358 = vmatmul.mubr.f32.gmra.mrb[58].mxu1 %v3750_v32  ;;  %2660 = vmatpush1.bf16.msra.mxu0 %v2659_v33  ;;  %v567_v33 = vld [vmem:[#allocation5 + $0x878] sm:$0xff]  ;;  %v573_v63 = vld [vmem:[#allocation5 + $0x8a8] sm:$0xff]  ;;  %v2691_v39 = vpack.c.bf16 %v569_v53, %v566_v51  ;;  %v582_v2 = vld [vmem:[#allocation5 + $0x8f0] sm:$0xff] }
 0x10c   :  { %861 = vmatprep.mubr.f32.mxu0 %v3644_v15  ;;  %1362 = vmatprep.mubr.f32.mxu1 %v3756_v41  ;;  %v537_v15 = vld [vmem:[#allocation5 + $0x788] sm:$0xff] }
 0x10d   :  { %2662 = vmatprep.subr.bf16.mxu0 %v2661_v34  ;;  %v2669_v45 = vpack.c.bf16 %v540_v22, %v537_v15  ;;  %v570_v34 = vld [vmem:[#allocation5 + $0x890] sm:$0xff]  ;;  %v2697_v22 = vpack.c.bf16 %v582_v2, %v579_v54 }
 0x10e   :  { %862 = vmatmul.mubr.f32.gmra.mrb[12].mxu0 %v3652_v7  ;;  %v3784_v7 = vld [vmem:[%s4241_s0 + $0x28] sm:$0xff]  ;;  %v2689_v37 = vpack.c.bf16 %v570_v34, %v567_v33 }
 0x10f   :  { %1363 = vmatmul.mubr.f32.gmra.mrb[60].mxu1 %v3764_v44  ;;  %2664 = vmatpush1.bf16.msra.mxu0 %v2663_v46  ;;  %v2693_v46 = vpack.c.bf16 %v576_v38, %v573_v63 }
 0x110   :  { %867 = vmatprep.mubr.f32.mxu0 %v3658_v25  ;;  %1367 = vmatprep.mubr.f32.mxu1 %v3770_v57  ;;  %v546_v25 = vld [vmem:[#allocation5 + $0x7d0] sm:$0xff] }
 0x111   :  { %2666 = vmatprep.subr.bf16.mxu0 %v2665_v47  ;;  %v2673_v35 = vpack.c.bf16 %v546_v25, %v543_v62  ;;  %v572_v47 = vld [vmem:[#allocation5 + $0x8a0] sm:$0xff]  ;;  %v271_v25 = vld [vmem:[%s4241_s0 + $0x238] sm:$0xff] }
 0x112   :  { %868 = vmatmul.mubr.f32.gmra.mrb[14].mxu0 %v3666_v18  ;;  %v3798_v18 = vld [vmem:[%s4241_s0 + $0x58] sm:$0xff]  ;;  %v2695_v15 = vpack.c.bf16 %v575_v52, %v572_v47  ;;  %v264_v62 = vld [vmem:[%s4241_s0 + $0x200] sm:$0xff] }
 0x113   :  { %1368 = vmatmul.mubr.f32.gmra.mrb[62].mxu1 %v3778_v5  ;;  %2668 = vmatpush1.bf16.msra.mxu0 %v2667_v55  ;;  %v578_v55 = vld [vmem:[#allocation5 + $0x8d0] sm:$0xff] }
 0x114   :  { %873 = vmatprep.mubr.f32.mxu0 %v3672_v30  ;;  %1437 = vmatprep.mubr.f32.mxu1 %v3784_v7  ;;  %v3806_v30 = vld [vmem:[%s4241_s0 + $0x50] sm:$0xff] }
 0x115   :  { %2670 = vmatprep.subr.bf16.mxu0 %v2669_v45  ;;  %v581_v45 = vld [vmem:[#allocation5 + $0x8e8] sm:$0xff] }
 0x116   :  { %874 = vmatmul.mubr.f32.gmra.mrb[16].mxu0 %v3680_v31  ;;  %v3812_v31 = vld [vmem:[%s4241_s0 + $0x88] sm:$0xff]  ;;  %v2699_v60 = vpack.c.bf16 %v581_v45, %v578_v55 }
 0x117   :  { %1438 = vmatmul.mubr.f32.vlgmr.msra.gmra.mrb[64].mxu1 %v3792_v24  ;;  %2672 = vmatpush1.bf16.msra.mxu0 %v2671_v21  ;;  %v277_v21 = vld [vmem:[%s4241_s0 + $0x268] sm:$0xff] }
 0x118   :  { %879 = vmatprep.mubr.f32.mxu0 %v3686_v50  ;;  %1442 = vmatprep.mubr.f32.mxu1 %v3798_v18  ;;  %v3820_v50 = vld [vmem:[%s4241_s0 + $0x80] sm:$0xff] }
 0x119   :  { %2674 = vmatprep.subr.bf16.mxu0 %v2673_v35  ;;  %v276_v35 = vld [vmem:[%s4241_s0 + $0x260] sm:$0xff] }
 0x11a   :  { %880 = vmatmul.mubr.f32.gmra.mrb[18].mxu0 %v3694_v42  ;;  %v3826_v42 = vld [vmem:[%s4241_s0 + $0xb8] sm:$0xff] }
 0x11b   :  { %1443 = vmatmul.mubr.f32.gmra.mrb[66].mxu1 %v3806_v30  ;;  %2676 = vmatpush1.bf16.msra.mxu0 %v2675_v11  ;;  %v295_v11 = vld [vmem:[%s4241_s0 + $0x2f8] sm:$0xff] }
 0x11c   :  { %885 = vmatprep.mubr.f32.mxu0 %v3700_v56  ;;  %1447 = vmatprep.mubr.f32.mxu1 %v3812_v31  ;;  %v3834_v56 = vld [vmem:[%s4241_s0 + $0xb0] sm:$0xff] }
 0x11d   :  { %2678 = vmatprep.subr.bf16.mxu0 %v2677_v12  ;;  %v156_v12 = vsub.s32 0, %v3939_v10 }
 0x11e   :  { %886 = vmatmul.mubr.f32.gmra.mrb[20].mxu0 %v3708_v58  ;;  %v3840_v58 = vld [vmem:[%s4241_s0 + $0xe8] sm:$0xff] }
 0x11f   :  { %1448 = vmatmul.mubr.f32.gmra.mrb[68].mxu1 %v3820_v50  ;;  %2680 = vmatpush1.bf16.msra.mxu0 %v2679_v13  ;;  %v161_v13 = vrot.slane %v152_v49, %v160_v40 }
 0x120   :  { %891 = vmatprep.mubr.f32.mxu0 %v3714_v6  ;;  %1452 = vmatprep.mubr.f32.mxu1 %v3826_v42  ;;  %v3848_v6 = vld [vmem:[%s4241_s0 + $0xe0] sm:$0xff] }
 0x121   :  { %2682 = vmatprep.subr.bf16.mxu0 %v2681_v20 }
 0x122   :  { %892 = vmatmul.mubr.f32.gmra.mrb[22].mxu0 %v3722_v8  ;;  %v3854_v8 = vld [vmem:[%s4241_s0 + $0x118] sm:$0xff] }
 0x123   :  { %1453 = vmatmul.mubr.f32.gmra.mrb[70].mxu1 %v3834_v56  ;;  %2684 = vmatpush1.bf16.msra.mxu0 %v2683_v48 }
 0x124   :  { %897 = vmatprep.mubr.f32.mxu0 %v3728_v16  ;;  %1457 = vmatprep.mubr.f32.mxu1 %v3840_v58  ;;  %v3862_v16 = vld [vmem:[%s4241_s0 + $0x110] sm:$0xff] }
 0x125   :  { %2686 = vmatprep.subr.bf16.mxu0 %v2685_v59  ;;  %v148_v59 = vld [vmem:[#allocation9] sm:$0x7] }
 0x126   :  { %898 = vmatmul.mubr.f32.gmra.mrb[24].mxu0 %v3736_v19  ;;  %v3868_v19 = vld [vmem:[%s4241_s0 + $0x148] sm:$0xff] }
 0x127   :  { %1458 = vmatmul.mubr.f32.gmra.mrb[72].mxu1 %v3848_v6  ;;  %2688 = vmatpush1.bf16.msra.mxu0 %v2687_v36 }
 0x128   :  { %903 = vmatprep.mubr.f32.mxu0 %v3742_v28  ;;  %1462 = vmatprep.mubr.f32.mxu1 %v3854_v8  ;;  %v3876_v28 = vld [vmem:[%s4241_s0 + $0x140] sm:$0xff] }
 0x129   :  { %2690 = vmatprep.subr.bf16.mxu0 %v2689_v37 }
 0x12a   :  { %904 = vmatmul.mubr.f32.gmra.mrb[26].mxu0 %v3750_v32  ;;  %v247_v32 = vld [vmem:[%s4241_s0 + $0x178] sm:$0xff] }
 0x12b   :  { %1463 = vmatmul.mubr.f32.gmra.mrb[74].mxu1 %v3862_v16  ;;  %2692 = vmatpush1.bf16.msra.mxu0 %v2691_v39 }
 0x12c   :  { %909 = vmatprep.mubr.f32.mxu0 %v3756_v41  ;;  %1467 = vmatprep.mubr.f32.mxu1 %v3868_v19  ;;  %v246_v41 = vld [vmem:[%s4241_s0 + $0x170] sm:$0xff] }
 0x12d   :  { %2694 = vmatprep.subr.bf16.mxu0 %v2693_v46 }
 0x12e   :  { %910 = vmatmul.mubr.f32.gmra.mrb[28].mxu0 %v3764_v44  ;;  %v252_v44 = vld [vmem:[%s4241_s0 + $0x1a0] sm:$0xff] }
 0x12f   :  { %1468 = vmatmul.mubr.f32.gmra.mrb[76].mxu1 %v3876_v28  ;;  %2696 = vmatpush1.bf16.msra.mxu0 %v2695_v15 }
 0x130   :  { %915 = vmatprep.mubr.f32.mxu0 %v3770_v57  ;;  %1472 = vmatprep.mubr.f32.mxu1 %v247_v32  ;;  %v259_v57 = vld [vmem:[%s4241_s0 + $0x1d8] sm:$0xff] }
 0x131   :  { %2698 = vmatprep.subr.bf16.mxu0 %v2697_v22 }
 0x132   :  { %916 = vmatmul.mubr.f32.gmra.mrb[30].mxu0 %v3778_v5  ;;  %v258_v5 = vld [vmem:[%s4241_s0 + $0x1d0] sm:$0xff] }
 0x133   :  { %1473 = vmatmul.mubr.f32.gmra.mrb[78].mxu1 %v246_v41  ;;  %2700 = vmatpush1.bf16.msra.mxu0 %v2699_v60 }
 0x134   :  { %986 = vmatprep.mubr.f32.mxu0 %v3784_v7  ;;  %1477 = vmatprep.mubr.f32.mxu1 %v253_v61  ;;  %v265_v7 = vld [vmem:[%s4241_s0 + $0x208] sm:$0xff] }
 0x136   :  { %987 = vmatmul.mubr.f32.vlgmr.msra.gmra.mrb[0].mxu0 %v3792_v24  ;;  %v270_v24 = vld [vmem:[%s4241_s0 + $0x230] sm:$0xff] }
 0x137   :  { %1478 = vmatmul.mubr.f32.gmra.mrb[80].mxu1 %v252_v44  ;;  %992 = vmatprep.mubr.f32.mxu0 %v3798_v18  ;;  %v282_v18 = vld [vmem:[%s4241_s0 + $0x290] sm:$0xff] }
 0x138   :  { %1482 = vmatprep.mubr.f32.mxu1 %v259_v57 }
 0x13a   :  { %993 = vmatmul.mubr.f32.gmra.mrb[2].mxu0 %v3806_v30  ;;  %v288_v30 = vld [vmem:[%s4241_s0 + $0x2c0] sm:$0xff]  ;;  %s4123_s0 = smov 0  }
 0x13b   :  { %1483 = vmatmul.mubr.f32.gmra.mrb[82].mxu1 %v258_v5  ;;  %998 = vmatprep.mubr.f32.mxu0 %v3812_v31  ;;  %v177_v31 = vunpack.c.l.s4 %v3197_v29 }
 0x13c   :  { %1487 = vmatprep.mubr.f32.mxu1 %v265_v7 }
 0x13d   :  { %v178_v20 = vunpack.c.0.s8 %v177_v31 }
 0x13e   :  { %999 = vmatmul.mubr.f32.gmra.mrb[4].mxu0 %v3820_v50  ;;  %v157_v50 = vrot.slane %v152_v49, %v156_v12 }
 0x13f   :  { %1488 = vmatmul.mubr.f32.gmra.mrb[84].mxu1 %v264_v62  ;;  %1004 = vmatprep.mubr.f32.mxu0 %v3826_v42  ;;  %v181_v23 = vsub.s32 %v178_v20, %v3939_v10 }
 0x140   :  { %1492 = vmatprep.mubr.f32.mxu1 %v271_v25  ;;  %v175_v14 = vcombine.low %v157_v50, %v161_v13 }
 0x141   :  { %v189_v43 = vrot.slane %v3198_v17, %v181_v23 }
 0x142   :  { %1005 = vmatmul.mubr.f32.gmra.mrb[6].mxu0 %v3834_v56  ;;  %v182_v42 = vrot.slane %v175_v14, %v181_v23 }
 0x143   :  { %1493 = vmatmul.mubr.f32.gmra.mrb[86].mxu1 %v270_v24  ;;  %1010 = vmatprep.mubr.f32.mxu0 %v3840_v58 }
 0x144   :  { %1497 = vmatprep.mubr.f32.mxu1 %v277_v21  ;;  %v190_v56 = vcombine.low %v182_v42, %v189_v43 }
 0x146   :  { %1011 = vmatmul.mubr.f32.gmra.mrb[8].mxu0 %v3848_v6  ;;  %v197_v48 = vrot.slane %v190_v56, %v181_v23 }
 0x147   :  { %1498 = vmatmul.mubr.f32.gmra.mrb[88].mxu1 %v276_v35  ;;  %1016 = vmatprep.mubr.f32.mxu0 %v3854_v8 }
 0x148   :  { %1502 = vmatprep.mubr.f32.mxu1 %v283_v0  ;;  %v3961_v26 = vadd.f32 %v197_v48, %v148_v59 }
 0x14a   :  { %1017 = vmatmul.mubr.f32.gmra.mrb[10].mxu0 %v3862_v16  ;;  %v3965_v33 = vrot.slane %v3961_v26, %v595_v27 }
 0x14b   :  { %1503 = vmatmul.mubr.f32.gmra.mrb[90].mxu1 %v282_v18  ;;  %1022 = vmatprep.mubr.f32.mxu0 %v3868_v19 }
 0x14c   :  { %1507 = vmatprep.mubr.f32.mxu1 %v289_v9 }
 0x14e   :  { %1023 = vmatmul.mubr.f32.gmra.mrb[12].mxu0 %v3876_v28 }
 0x14f   :  { %1508 = vmatmul.mubr.f32.gmra.mrb[92].mxu1 %v288_v30  ;;  %1028 = vmatprep.mubr.f32.mxu0 %v247_v32 }
 0x150   :  { %1512 = vmatprep.mubr.f32.mxu1 %v295_v11 }
 0x152   :  { %1029 = vmatmul.mubr.f32.gmra.mrb[14].mxu0 %v246_v41 }
 0x153   :  { %1513 = vmatmul.mubr.f32.gmra.mrb[94].mxu1 %v294_v4  ;;  %1034 = vmatprep.mubr.f32.mxu0 %v253_v61 }
 0x156   :  { %1035 = vmatmul.mubr.f32.gmra.mrb[16].mxu0 %v252_v44 }
 0x157   :  { %1040 = vmatprep.mubr.f32.mxu0 %v259_v57 }
 0x15a   :  { %1041 = vmatmul.mubr.f32.gmra.mrb[18].mxu0 %v258_v5 }
 0x15b   :  { %1046 = vmatprep.mubr.f32.mxu0 %v265_v7 }
 0x15e   :  { %1047 = vmatmul.mubr.f32.gmra.mrb[20].mxu0 %v264_v62 }
 0x15f   :  { %1052 = vmatprep.mubr.f32.mxu0 %v271_v25 }
 0x162   :  { %1053 = vmatmul.mubr.f32.gmra.mrb[22].mxu0 %v270_v24 }
 0x163   :  { %1058 = vmatprep.mubr.f32.mxu0 %v277_v21 }
 0x166   :  { %1059 = vmatmul.mubr.f32.gmra.mrb[24].mxu0 %v276_v35 }
 0x167   :  { %1064 = vmatprep.mubr.f32.mxu0 %v283_v0 }
 0x16a   :  { %v2159_v58 = vpop.f32.mrb[0].mxu1  ;;  %1065 = vmatmul.mubr.f32.gmra.mrb[26].mxu0 %v282_v18 }
 0x16b   :  { %v2160_v34 = vpop.f32.mrb[1].mxu1  ;;  %1070 = vmatprep.mubr.f32.mxu0 %v289_v9 }
 0x16c   :  { %v2161_v6 = vadd.f32 %v2160_v34, %v2159_v58 }
 0x16e   :  { %v3968_v36 = vadd.f32 %v2161_v6, %v3965_v33  ;;  %v2162_v37 = vpop.f32.mrb[2].mxu1  ;;  %1071 = vmatmul.mubr.f32.gmra.mrb[28].mxu0 %v288_v30 }
 0x16f   :  { %v2163_v51 = vpop.f32.mrb[3].mxu1  ;;  %1076 = vmatprep.mubr.f32.mxu0 %v295_v11 }
 0x170   :  { %v2164_v53 = vadd.f32 %v2163_v51, %v2162_v37 }
 0x172   :  { %v3971_v8 = vadd.f32 %v2164_v53, %v3965_v33  ;;  %v2165_v63 = vpop.f32.mrb[4].mxu1  ;;  %1077 = vmatmul.mubr.f32.gmra.mrb[30].mxu0 %v294_v4 }
 0x173   :  { %v2166_v38 = vpop.f32.mrb[5].mxu1 }
 0x174   :  { %v2167_v16 = vadd.f32 %v2166_v38, %v2165_v63 }
 0x176   :  { %v3974_v39 = vadd.f32 %v2167_v16, %v3965_v33  ;;  %v2168_v46 = vpop.f32.mrb[6].mxu1 }
 0x177   :  { %v2169_v47 = vpop.f32.mrb[7].mxu1 }
 0x178   :  { %v2170_v52 = vadd.f32 %v2169_v47, %v2168_v46 }
 0x17a   :  { %v3977_v19 = vadd.f32 %v2170_v52, %v3965_v33  ;;  %v2171_v54 = vpop.f32.mrb[8].mxu1 }
 0x17b   :  { %v2172_v2 = vpop.f32.mrb[9].mxu1 }
 0x17c   :  { %v2173_v28 = vadd.f32 %v2172_v2, %v2171_v54 }
 0x17e   :  { %v3980_v15 = vadd.f32 %v2173_v28, %v3965_v33  ;;  %v2174_v22 = vpop.f32.mrb[10].mxu1 }
 0x17f   :  { %v2175_v55 = vpop.f32.mrb[11].mxu1 }
 0x180   :  { %v2176_v45 = vadd.f32 %v2175_v55, %v2174_v22 }
 0x182   :  { %v3983_v32 = vadd.f32 %v2176_v45, %v3965_v33  ;;  %v2177_v41 = vpop.f32.mrb[12].mxu1 }
 0x183   :  { %v2178_v60 = vpop.f32.mrb[13].mxu1 }
 0x184   :  { %v2179_v61 = vadd.f32 %v2178_v60, %v2177_v41 }
 0x186   :  { %v3986_v44 = vadd.f32 %v2179_v61, %v3965_v33  ;;  %v2180_v57 = vpop.f32.mrb[14].mxu1 }
 0x187   :  { %v2181_v5 = vpop.f32.mrb[15].mxu1 }
 0x188   :  { %v2182_v7 = vadd.f32 %v2181_v5, %v2180_v57 }
 0x18a   :  { %v3989_v62 = vadd.f32 %v2182_v7, %v3965_v33  ;;  %v2183_v25 = vpop.f32.mrb[16].mxu1 }
 0x18b   :  { %v2184_v24 = vpop.f32.mrb[17].mxu1 }
 0x18c   :  { %v2185_v21 = vadd.f32 %v2184_v24, %v2183_v25 }
 0x18e   :  { %v3992_v35 = vadd.f32 %v2185_v21, %v3965_v33  ;;  %v2186_v0 = vpop.f32.mrb[18].mxu1 }
 0x18f   :  { %v2187_v3 = vpop.f32.mrb[19].mxu1 }
 0x190   :  { %v2188_v18 = vadd.f32 %v2187_v3, %v2186_v0 }
 0x192   :  { %v3995_v9 = vadd.f32 %v2188_v18, %v3965_v33  ;;  %v2189_v30 = vpop.f32.mrb[20].mxu1 }
 0x193   :  { %v2190_v11 = vpop.f32.mrb[21].mxu1 }
 0x194   :  { %v2191_v29 = vadd.f32 %v2190_v11, %v2189_v30 }
 0x196   :  { %v3998_v31 = vadd.f32 %v2191_v29, %v3965_v33  ;;  %v2192_v49 = vpop.f32.mrb[22].mxu1 }
 0x197   :  { %v2193_v4 = vpop.f32.mrb[23].mxu1 }
 0x198   :  { %v2194_v50 = vadd.f32 %v2193_v4, %v2192_v49 }
 0x19a   :  { %v4001_v13 = vadd.f32 %v2194_v50, %v3965_v33  ;;  %v2195_v20 = vpop.f32.mrb[24].mxu1 }
 0x19b   :  { %v2196_v14 = vpop.f32.mrb[25].mxu1 }
 0x19c   :  { %v2197_v23 = vadd.f32 %v2196_v14, %v2195_v20 }
 0x19e   :  { %v4004_v42 = vadd.f32 %v2197_v23, %v3965_v33  ;;  %v2198_v43 = vpop.f32.mrb[26].mxu1 }
 0x19f   :  { %v2199_v56 = vpop.f32.mrb[27].mxu1 }
 0x1a0   :  { %v2200_v48 = vadd.f32 %v2199_v56, %v2198_v43 }
 0x1a2   :  { %v4007_v59 = vadd.f32 %v2200_v48, %v3965_v33  ;;  %v2201_v27 = vpop.f32.mrb[28].mxu1 }
 0x1a3   :  { %v2202_v58 = vpop.f32.mrb[29].mxu1 }
 0x1a4   :  { %v2203_v34 = vadd.f32 %v2202_v58, %v2201_v27 }
 0x1a6   :  { %v4010_v6 = vadd.f32 %v2203_v34, %v3965_v33  ;;  %v2204_v37 = vpop.f32.mrb[30].mxu1 }
 0x1a7   :  { %v2205_v51 = vpop.f32.mrb[31].mxu1 }
 0x1a8   :  { %v2206_v53 = vadd.f32 %v2205_v51, %v2204_v37 }
 0x1aa   :  { %v4013_v63 = vadd.f32 %v2206_v53, %v3965_v33  ;;  %v2239_v38 = vpop.f32.mrb[32].mxu1 }
 0x1ab   :  { %v2240_v16 = vpop.f32.mrb[33].mxu1 }
 0x1ac   :  { %v2241_v46 = vadd.f32 %v2240_v16, %v2239_v38 }
 0x1ae   :  { %v4016_v47 = vadd.f32 %v2241_v46, %v3968_v36  ;;  %v2242_v52 = vpop.f32.mrb[34].mxu1 }
 0x1af   :  { %v2243_v54 = vpop.f32.mrb[35].mxu1 }
 0x1b0   :  { %v2244_v2 = vadd.f32 %v2243_v54, %v2242_v52 }
 0x1b2   :  { %v4019_v28 = vadd.f32 %v2244_v2, %v3971_v8  ;;  %v2245_v22 = vpop.f32.mrb[36].mxu1 }
 0x1b3   :  { %v2246_v55 = vpop.f32.mrb[37].mxu1 }
 0x1b4   :  { %v2247_v45 = vadd.f32 %v2246_v55, %v2245_v22 }
 0x1b6   :  { %v4022_v41 = vadd.f32 %v2247_v45, %v3974_v39  ;;  %v2248_v33 = vpop.f32.mrb[38].mxu1 }
 0x1b7   :  { %v2249_v60 = vpop.f32.mrb[39].mxu1 }
 0x1b8   :  { %v2250_v61 = vadd.f32 %v2249_v60, %v2248_v33 }
 0x1ba   :  { %v4025_v57 = vadd.f32 %v2250_v61, %v3977_v19  ;;  %v2251_v36 = vpop.f32.mrb[40].mxu1 }
 0x1bb   :  { %v2252_v5 = vpop.f32.mrb[41].mxu1 }
 0x1bc   :  { %v2253_v7 = vadd.f32 %v2252_v5, %v2251_v36 }
 0x1be   :  { %v4028_v25 = vadd.f32 %v2253_v7, %v3980_v15  ;;  %v2254_v8 = vpop.f32.mrb[42].mxu1 }
 0x1bf   :  { %v2255_v24 = vpop.f32.mrb[43].mxu1 }
 0x1c0   :  { %v2256_v21 = vadd.f32 %v2255_v24, %v2254_v8 }
 0x1c2   :  { %v4031_v0 = vadd.f32 %v2256_v21, %v3983_v32  ;;  %v2257_v39 = vpop.f32.mrb[44].mxu1 }
 0x1c3   :  { %v2258_v3 = vpop.f32.mrb[45].mxu1 }
 0x1c4   :  { %v2259_v18 = vadd.f32 %v2258_v3, %v2257_v39 }
 0x1c6   :  { %v4034_v30 = vadd.f32 %v2259_v18, %v3986_v44  ;;  %v2260_v19 = vpop.f32.mrb[46].mxu1 }
 0x1c7   :  { %v2261_v11 = vpop.f32.mrb[47].mxu1 }
 0x1c8   :  { %v2262_v29 = vadd.f32 %v2261_v11, %v2260_v19 }
 0x1ca   :  { %v4037_v49 = vadd.f32 %v2262_v29, %v3989_v62  ;;  %v2263_v15 = vpop.f32.mrb[48].mxu1 }
 0x1cb   :  { %v2264_v4 = vpop.f32.mrb[49].mxu1 }
 0x1cc   :  { %v2265_v50 = vadd.f32 %v2264_v4, %v2263_v15 }
 0x1ce   :  { %v4040_v20 = vadd.f32 %v2265_v50, %v3992_v35  ;;  %v2266_v32 = vpop.f32.mrb[50].mxu1 }
 0x1cf   :  { %v2267_v14 = vpop.f32.mrb[51].mxu1 }
 0x1d0   :  { %v2268_v23 = vadd.f32 %v2267_v14, %v2266_v32 }
 0x1d2   :  { %v4043_v43 = vadd.f32 %v2268_v23, %v3995_v9  ;;  %v2269_v44 = vpop.f32.mrb[52].mxu1 }
 0x1d3   :  { %v2270_v56 = vpop.f32.mrb[53].mxu1 }
 0x1d4   :  { %v2271_v48 = vadd.f32 %v2270_v56, %v2269_v44 }
 0x1d6   :  { %v4046_v27 = vadd.f32 %v2271_v48, %v3998_v31  ;;  %v2272_v62 = vpop.f32.mrb[54].mxu1  ;;  %v4073_v48 = vrot.slane %v3961_v26, %v156_v12 }
 0x1d7   :  { %v2273_v58 = vpop.f32.mrb[55].mxu1 }
 0x1d8   :  { %v2274_v34 = vadd.f32 %v2273_v58, %v2272_v62  ;;  %v4078_v62 = vrot.slane %v3961_v26, %v160_v40 }
 0x1da   :  { %v4049_v37 = vadd.f32 %v2274_v34, %v4001_v13  ;;  %v2275_v35 = vpop.f32.mrb[56].mxu1 }
 0x1db   :  { %v2276_v51 = vpop.f32.mrb[57].mxu1 }
 0x1dc   :  { %v2277_v53 = vadd.f32 %v2276_v51, %v2275_v35 }
 0x1de   :  { %v4052_v38 = vadd.f32 %v2277_v53, %v4004_v42  ;;  %v2278_v9 = vpop.f32.mrb[58].mxu1 }
 0x1df   :  { %v2279_v16 = vpop.f32.mrb[59].mxu1 }
 0x1e0   :  { %v2280_v46 = vadd.f32 %v2279_v16, %v2278_v9 }
 0x1e2   :  { %v4055_v52 = vadd.f32 %v2280_v46, %v4007_v59  ;;  %v2281_v31 = vpop.f32.mrb[60].mxu1 }
 0x1e3   :  { %v2282_v54 = vpop.f32.mrb[61].mxu1 }
 0x1e4   :  { %v2283_v2 = vadd.f32 %v2282_v54, %v2281_v31 }
 0x1e6   :  { %v4058_v22 = vadd.f32 %v2283_v2, %v4010_v6  ;;  %v2284_v13 = vpop.f32.mrb[62].mxu1 }
 0x1e7   :  { %v2285_v55 = vpop.f32.mrb[63].mxu1 }
 0x1e8   :  { %v2286_v45 = vadd.f32 %v2285_v55, %v2284_v13 }
 0x1ea   :  { %v4061_v33 = vadd.f32 %v2286_v45, %v4013_v63  ;;  %v2319_v42 = vpop.f32.mrb[64].mxu1 }
 0x1eb   :  { %v2320_v60 = vpop.f32.mrb[65].mxu1 }
 0x1ec   :  { %v2321_v61 = vadd.f32 %v2320_v60, %v2319_v42 }
 0x1ee   :  { %v1440_v36 = vadd.f32 %v2321_v61, %v4016_v47  ;;  %v2322_v5 = vpop.f32.mrb[66].mxu1 }
 0x1ef   :  { %v2323_v59 = vpop.f32.mrb[67].mxu1 }
 0x1f0   :  { %1520 = vst [vmem:[#allocation2 + $0x10] sm:$0xff] %v1440_v36  ;;  %v2324_v7 = vadd.f32 %v2323_v59, %v2322_v5 }
 0x1f2   :  { %v1445_v8 = vadd.f32 %v2324_v7, %v4019_v28  ;;  %v2325_v24 = vpop.f32.mrb[68].mxu1 }
 0x1f3   :  { %v2326_v6 = vpop.f32.mrb[69].mxu1 }
 0x1f4   :  { %1523 = vst [vmem:[#allocation2 + $0x28] sm:$0xff] %v1445_v8  ;;  %v2327_v21 = vadd.f32 %v2326_v6, %v2325_v24 }
 0x1f6   :  { %v1450_v39 = vadd.f32 %v2327_v21, %v4022_v41  ;;  %v2328_v3 = vpop.f32.mrb[70].mxu1 }
 0x1f7   :  { %v2329_v63 = vpop.f32.mrb[71].mxu1 }
 0x1f8   :  { %1526 = vst [vmem:[#allocation2 + $0x40] sm:$0xff] %v1450_v39  ;;  %v2330_v18 = vadd.f32 %v2329_v63, %v2328_v3 }
 0x1fa   :  { %v1455_v19 = vadd.f32 %v2330_v18, %v4025_v57  ;;  %v2331_v11 = vpop.f32.mrb[72].mxu1 }
 0x1fb   :  { %v2332_v47 = vpop.f32.mrb[73].mxu1 }
 0x1fc   :  { %1529 = vst [vmem:[#allocation2 + $0x58] sm:$0xff] %v1455_v19  ;;  %v2333_v29 = vadd.f32 %v2332_v47, %v2331_v11 }
 0x1fe   :  { %v1460_v15 = vadd.f32 %v2333_v29, %v4028_v25  ;;  %v2334_v4 = vpop.f32.mrb[74].mxu1 }
 0x1ff   :  { %v2335_v28 = vpop.f32.mrb[75].mxu1 }
 0x200   :  { %1532 = vst [vmem:[#allocation2 + $0x70] sm:$0xff] %v1460_v15  ;;  %v2336_v50 = vadd.f32 %v2335_v28, %v2334_v4 }
 0x202   :  { %v1465_v32 = vadd.f32 %v2336_v50, %v4031_v0  ;;  %v2337_v14 = vpop.f32.mrb[76].mxu1 }
 0x203   :  { %v2338_v41 = vpop.f32.mrb[77].mxu1 }
 0x204   :  { %1535 = vst [vmem:[#allocation2 + $0x88] sm:$0xff] %v1465_v32  ;;  %v2339_v23 = vadd.f32 %v2338_v41, %v2337_v14 }
 0x206   :  { %v1470_v44 = vadd.f32 %v2339_v23, %v4034_v30  ;;  %v2340_v56 = vpop.f32.mrb[78].mxu1 }
 0x207   :  { %v2341_v57 = vpop.f32.mrb[79].mxu1 }
 0x208   :  { %1538 = vst [vmem:[#allocation2 + $0xa0] sm:$0xff] %v1470_v44  ;;  %v2342_v25 = vadd.f32 %v2341_v57, %v2340_v56 }
 0x209   :  { %v988_v58 = vpop.f32.mrb[0].mxu0 }
 0x20a   :  { %v1475_v0 = vadd.f32 %v2342_v25, %v4037_v49  ;;  %v2343_v34 = vpop.f32.mrb[80].mxu1  ;;  %v2892_v30 = vadd.f32 %v988_v58, %v4073_v48  ;;  %v990_v35 = vpop.f32.mrb[1].mxu0 }
 0x20b   :  { %v2344_v51 = vpop.f32.mrb[81].mxu1  ;;  %v2893_v53 = vadd.f32 %v990_v35, %v4078_v62 }
 0x20c   :  { %1541 = vst [vmem:[#allocation2 + $0xb8] sm:$0xff] %v1475_v0  ;;  %v2345_v12 = vadd.f32 %v2344_v51, %v2343_v34  ;;  %1518 = vst [vmem:[#allocation2] sm:$0xff] %v2892_v30 }
 0x20d   :  { %1519 = vst [vmem:[#allocation2 + $0x8] sm:$0xff] %v2893_v53  ;;  %v994_v10 = vpop.f32.mrb[2].mxu0 }
 0x20e   :  { %v1480_v9 = vadd.f32 %v2345_v12, %v4040_v20  ;;  %v2346_v16 = vpop.f32.mrb[82].mxu1  ;;  %v2894_v40 = vadd.f32 %v994_v10, %v4073_v48  ;;  %v996_v26 = vpop.f32.mrb[3].mxu0 }
 0x20f   :  { %v2347_v49 = vpop.f32.mrb[83].mxu1  ;;  %v2895_v46 = vadd.f32 %v996_v26, %v4078_v62 }
 0x210   :  { %1544 = vst [vmem:[#allocation2 + $0xd0] sm:$0xff] %v1480_v9  ;;  %v2348_v31 = vadd.f32 %v2347_v49, %v2346_v16  ;;  %1521 = vst [vmem:[#allocation2 + $0x18] sm:$0xff] %v2894_v40 }
 0x211   :  { %1522 = vst [vmem:[#allocation2 + $0x20] sm:$0xff] %v2895_v46  ;;  %v1000_v2 = vpop.f32.mrb[4].mxu0 }
 0x212   :  { %v1485_v54 = vadd.f32 %v2348_v31, %v4043_v43  ;;  %v2349_v13 = vpop.f32.mrb[84].mxu1  ;;  %v2896_v55 = vadd.f32 %v1000_v2, %v4073_v48  ;;  %v1002_v45 = vpop.f32.mrb[5].mxu0 }
 0x213   :  { %v2350_v20 = vpop.f32.mrb[85].mxu1  ;;  %v2897_v42 = vadd.f32 %v1002_v45, %v4078_v62 }
 0x214   :  { %1547 = vst [vmem:[#allocation2 + $0xe8] sm:$0xff] %v1485_v54  ;;  %v2351_v60 = vadd.f32 %v2350_v20, %v2349_v13  ;;  %1524 = vst [vmem:[#allocation2 + $0x30] sm:$0xff] %v2896_v55 }
 0x215   :  { %1525 = vst [vmem:[#allocation2 + $0x38] sm:$0xff] %v2897_v42  ;;  %v1006_v36 = vpop.f32.mrb[6].mxu0 }
 0x216   :  { %v1490_v61 = vadd.f32 %v2351_v60, %v4046_v27  ;;  %v2352_v5 = vpop.f32.mrb[86].mxu1  ;;  %v2898_v59 = vadd.f32 %v1006_v36, %v4073_v48  ;;  %v1008_v7 = vpop.f32.mrb[7].mxu0 }
 0x217   :  { %v2353_v43 = vpop.f32.mrb[87].mxu1  ;;  %v2899_v8 = vadd.f32 %v1008_v7, %v4078_v62 }
 0x218   :  { %1550 = vst [vmem:[#allocation2 + $0x100] sm:$0xff] %v1490_v61  ;;  %v2354_v24 = vadd.f32 %v2353_v43, %v2352_v5  ;;  %1527 = vst [vmem:[#allocation2 + $0x48] sm:$0xff] %v2898_v59 }
 0x219   :  { %1528 = vst [vmem:[#allocation2 + $0x50] sm:$0xff] %v2899_v8  ;;  %v1012_v21 = vpop.f32.mrb[8].mxu0 }
 0x21a   :  { %v1495_v6 = vadd.f32 %v2354_v24, %v4049_v37  ;;  %v2355_v39 = vpop.f32.mrb[88].mxu1  ;;  %v2900_v3 = vadd.f32 %v1012_v21, %v4073_v48  ;;  %v1014_v63 = vpop.f32.mrb[9].mxu0 }
 0x21b   :  { %v2356_v27 = vpop.f32.mrb[89].mxu1  ;;  %v2901_v18 = vadd.f32 %v1014_v63, %v4078_v62 }
 0x21c   :  { %1553 = vst [vmem:[#allocation2 + $0x118] sm:$0xff] %v1495_v6  ;;  %v2357_v19 = vadd.f32 %v2356_v27, %v2355_v39  ;;  %1530 = vst [vmem:[#allocation2 + $0x60] sm:$0xff] %v2900_v3  ;;  %v4121_v27 = vmov 0.0  }
 0x21d   :  { %1531 = vst [vmem:[#allocation2 + $0x68] sm:$0xff] %v2901_v18  ;;  %v1018_v47 = vpop.f32.mrb[10].mxu0 }
 0x21e   :  { %v1500_v11 = vadd.f32 %v2357_v19, %v4052_v38  ;;  %v2358_v29 = vpop.f32.mrb[90].mxu1  ;;  %v2902_v15 = vadd.f32 %v1018_v47, %v4073_v48  ;;  %v1020_v4 = vpop.f32.mrb[11].mxu0 }
 0x21f   :  { %v2359_v37 = vpop.f32.mrb[91].mxu1  ;;  %v2903_v28 = vadd.f32 %v1020_v4, %v4078_v62 }
 0x220   :  { %1556 = vst [vmem:[#allocation2 + $0x130] sm:$0xff] %v1500_v11  ;;  %v2360_v50 = vadd.f32 %v2359_v37, %v2358_v29  ;;  %1533 = vst [vmem:[#allocation2 + $0x78] sm:$0xff] %v2902_v15 }
 0x221   :  { %1534 = vst [vmem:[#allocation2 + $0x80] sm:$0xff] %v2903_v28  ;;  %v1024_v14 = vpop.f32.mrb[12].mxu0 }
 0x222   :  { %v1505_v32 = vadd.f32 %v2360_v50, %v4055_v52  ;;  %v2361_v41 = vpop.f32.mrb[92].mxu1  ;;  %v2904_v23 = vadd.f32 %v1024_v14, %v4073_v48  ;;  %v1026_v44 = vpop.f32.mrb[13].mxu0 }
 0x223   :  { %v2362_v38 = vpop.f32.mrb[93].mxu1  ;;  %v2905_v56 = vadd.f32 %v1026_v44, %v4078_v62 }
 0x224   :  { %1559 = vst [vmem:[#allocation2 + $0x148] sm:$0xff] %v1505_v32  ;;  %v2363_v57 = vadd.f32 %v2362_v38, %v2361_v41  ;;  %1536 = vst [vmem:[#allocation2 + $0x90] sm:$0xff] %v2904_v23 }
 0x225   :  { %1537 = vst [vmem:[#allocation2 + $0x98] sm:$0xff] %v2905_v56  ;;  %v1030_v0 = vpop.f32.mrb[14].mxu0 }
 0x226   :  { %v1510_v25 = vadd.f32 %v2363_v57, %v4058_v22  ;;  %v2364_v58 = vpop.f32.mrb[94].mxu1  ;;  %v2906_v34 = vadd.f32 %v1030_v0, %v4073_v48  ;;  %v1032_v30 = vpop.f32.mrb[15].mxu0 }
 0x227   :  { %v2365_v52 = vpop.f32.mrb[95].mxu1  ;;  %v2907_v35 = vadd.f32 %v1032_v30, %v4078_v62 }
 0x228   :  { %1562 = vst [vmem:[#allocation2 + $0x160] sm:$0xff] %v1510_v25  ;;  %v2366_v51 = vadd.f32 %v2365_v52, %v2364_v58  ;;  %1539 = vst [vmem:[#allocation2 + $0xa8] sm:$0xff] %v2906_v34 }
 0x229   :  { %1540 = vst [vmem:[#allocation2 + $0xb0] sm:$0xff] %v2907_v35  ;;  %v1036_v12 = vpop.f32.mrb[16].mxu0 }
 0x22a   :  { %v1515_v53 = vadd.f32 %v2366_v51, %v4061_v33  ;;  %v2908_v9 = vadd.f32 %v1036_v12, %v4073_v48  ;;  %v1038_v10 = vpop.f32.mrb[17].mxu0 }
 0x22b   :  { %v2909_v22 = vadd.f32 %v1038_v10, %v4078_v62 }
 0x22c   :  { %1565 = vst [vmem:[#allocation2 + $0x178] sm:$0xff] %v1515_v53  ;;  %1542 = vst [vmem:[#allocation2 + $0xc0] sm:$0xff] %v2908_v9 }
 0x22d   :  { %1543 = vst [vmem:[#allocation2 + $0xc8] sm:$0xff] %v2909_v22  ;;  %v1042_v16 = vpop.f32.mrb[18].mxu0 }
 0x22e   :  { %v2910_v40 = vadd.f32 %v1042_v16, %v4073_v48  ;;  %v1044_v26 = vpop.f32.mrb[19].mxu0 }
 0x22f   :  { %v2911_v49 = vadd.f32 %v1044_v26, %v4078_v62 }
 0x230   :  { %1545 = vst [vmem:[#allocation2 + $0xd8] sm:$0xff] %v2910_v40 }
 0x231   :  { %1546 = vst [vmem:[#allocation2 + $0xe0] sm:$0xff] %v2911_v49  ;;  %v1048_v46 = vpop.f32.mrb[20].mxu0 }
 0x232   :  { %v2912_v33 = vadd.f32 %v1048_v46, %v4073_v48  ;;  %v1050_v31 = vpop.f32.mrb[21].mxu0 }
 0x233   :  { %v2913_v54 = vadd.f32 %v1050_v31, %v4078_v62 }
 0x234   :  { %1548 = vst [vmem:[#allocation2 + $0xf0] sm:$0xff] %v2912_v33 }
 0x235   :  { %1549 = vst [vmem:[#allocation2 + $0xf8] sm:$0xff] %v2913_v54  ;;  %v1054_v2 = vpop.f32.mrb[22].mxu0 }
 0x236   :  { %v2914_v13 = vadd.f32 %v1054_v2, %v4073_v48  ;;  %v1056_v55 = vpop.f32.mrb[23].mxu0 }
 0x237   :  { %v2915_v45 = vadd.f32 %v1056_v55, %v4078_v62 }
 0x238   :  { %1551 = vst [vmem:[#allocation2 + $0x108] sm:$0xff] %v2914_v13 }
 0x239   :  { %1552 = vst [vmem:[#allocation2 + $0x110] sm:$0xff] %v2915_v45  ;;  %v1060_v20 = vpop.f32.mrb[24].mxu0 }
 0x23a   :  { %v2916_v42 = vadd.f32 %v1060_v20, %v4073_v48  ;;  %v1062_v60 = vpop.f32.mrb[25].mxu0 }
 0x23b   :  { %v2917_v61 = vadd.f32 %v1062_v60, %v4078_v62 }
 0x23c   :  { %1554 = vst [vmem:[#allocation2 + $0x120] sm:$0xff] %v2916_v42 }
 0x23d   :  { %1555 = vst [vmem:[#allocation2 + $0x128] sm:$0xff] %v2917_v61  ;;  %v1066_v36 = vpop.f32.mrb[26].mxu0 }
 0x23e   :  { %v2918_v5 = vadd.f32 %v1066_v36, %v4073_v48  ;;  %v1068_v59 = vpop.f32.mrb[27].mxu0 }
 0x23f   :  { %v2919_v7 = vadd.f32 %v1068_v59, %v4078_v62 }
 0x240   :  { %1557 = vst [vmem:[#allocation2 + $0x138] sm:$0xff] %v2918_v5 }
 0x241   :  { %1558 = vst [vmem:[#allocation2 + $0x140] sm:$0xff] %v2919_v7  ;;  %v1072_v43 = vpop.f32.mrb[28].mxu0 }
 0x242   :  { %v2920_v8 = vadd.f32 %v1072_v43, %v4073_v48  ;;  %v1074_v24 = vpop.f32.mrb[29].mxu0 }
 0x243   :  { %v2921_v6 = vadd.f32 %v1074_v24, %v4078_v62 }
 0x244   :  { %1560 = vst [vmem:[#allocation2 + $0x150] sm:$0xff] %v2920_v8 }
 0x245   :  { %1561 = vst [vmem:[#allocation2 + $0x158] sm:$0xff] %v2921_v6  ;;  %v1078_v21 = vpop.f32.mrb[30].mxu0 }
 0x246   :  { %v2922_v39 = vadd.f32 %v1078_v21, %v4073_v48  ;;  %v1080_v3 = vpop.f32.mrb[31].mxu0 }
 0x247   :  { %v2923_v63 = vadd.f32 %v1080_v3, %v4078_v62 }
 0x248   :  { %1563 = vst [vmem:[#allocation2 + $0x168] sm:$0xff] %v2922_v39 }
 0x249   :  { %1564 = vst [vmem:[#allocation2 + $0x170] sm:$0xff] %v2923_v63 }
 0x24a LB: > { %v1594_v18 = vld [vmem:[#allocation7 + $0x8] sm:$0xff]  ;;  %v1597_v19 = vld [vmem:[#allocation7 + $0x20] sm:$0xff]  ;;  %v1596_v47 = vld [vmem:[#allocation7 + $0x18] sm:$0xff]  ;;  %v3199_v15 = vmov 0.0|0.0   ;;  %v3200_v4 = vmov 0.0   ;;  %vm3201_vm0 = vmmov 0   ;;  %s3187_s0 = sphi %s4123_s0, %s1581_s0   ;;  %v3183_v27 = vphi %v4121_v27, %v4254_v27  }
 0x24b   : > { %v1593_v48 = vld [vmem:[#allocation7] sm:$0xff]  ;;  %v2797_v11 = vpack.c.bf16 %v1597_v19, %v1594_v18  ;;  %v1600_v62 = vld [vmem:[#allocation7 + $0x38] sm:$0xff]  ;;  %v1603_v29 = vld [vmem:[#allocation7 + $0x50] sm:$0xff]  ;;  %2829 = vmatprep.subr.bf16.mxu1 %v3199_v15  ;;  %1705 = vmatprep.mubr.f32.mxu0 %v3200_v4  ;;  %s1583_s19 = ssub.s32 15, %s3187_s0  ;;  %s1581_s0 = sadd.s32 1, %s3187_s0  }
 0x24c   : > { %v2799_v37 = vpack.c.bf16 %v1596_v47, %v1593_v48  ;;  %v2801_v28 = vpack.c.bf16 %v1603_v29, %v1600_v62  ;;  %v1599_v50 = vld [vmem:[#allocation7 + $0x30] sm:$0xff]  ;;  %v1602_v32 = vld [vmem:[#allocation7 + $0x48] sm:$0xff]  ;;  %2445 = vmatprep.mubr.msk.f32.mxu1 %vm3201_vm0, %v3200_v4  ;;  %v1609_v41 = vld [vmem:[#allocation7 + $0x80] sm:$0xff]  ;;  %s2116_s3 = sshll.u32 %s1583_s19, 3  ;;  %p1805_p6 = scmp.lt.s32.totalorder %s1583_s19, 8 }
 0x24d   : > { %v1606_v14 = vld [vmem:[#allocation7 + $0x68] sm:$0xff]  ;;  %2798 = vmatprep.subr.bf16.mxu0 %v2797_v11  ;;  %v2803_v23 = vpack.c.bf16 %v1602_v32, %v1599_v50  ;;  %v1605_v38 = vld [vmem:[#allocation7 + $0x60] sm:$0xff]  ;;  %v1608_v56 = vld [vmem:[#allocation7 + $0x78] sm:$0xff]  ;;  %s1585_s28 = sshra.s32 %s2116_s3, 3  ;;  %p1578_p7 = scmp.ge.s32.totalorder %s1581_s0, 16  }
 0x24e   : > { %2800 = vmatpush1.bf16.msra.mxu0 %v2799_v37  ;;  %v2805_v44 = vpack.c.bf16 %v1609_v41, %v1606_v14  ;;  %v1612_v57 = vld [vmem:[#allocation7 + $0x98] sm:$0xff]  ;;  %v1615_v25 = vld [vmem:[#allocation7 + $0xb0] sm:$0xff]  ;;  %v2807_v0 = vpack.c.bf16 %v1608_v56, %v1605_v38  ;;  %v1614_v30 = vld [vmem:[#allocation7 + $0xa8] sm:$0xff]  ;;  %s2126_s21 = smul.u32 24, %s1585_s28  ;;  %vm3203_vm2 = vmmov (%p1578_p7), 0   ;;  %vm1924_vm3 = vcmask (%p1578_p7), 523264  }
 0x24f   : > { %2802 = vmatprep.subr.bf16.mxu0 %v2801_v28  ;;  %v1611_v58 = vld [vmem:[#allocation7 + $0x90] sm:$0xff]  ;;  %v2809_v34 = vpack.c.bf16 %v1615_v25, %v1612_v57  ;;  %v1598_v35 = vld [vmem:[#allocation7 + $0x28] sm:$0xff]  ;;  %v1621_v53 = vld [vmem:[#allocation7 + $0xe0] sm:$0xff]  ;;  %s1806_s24 = scalar_select %p1805_p6, 1, 0 }
 0x250   : > { %v1595_v52 = vld [vmem:[#allocation7 + $0x10] sm:$0xff]  ;;  %v1618_v51 = vld [vmem:[#allocation7 + $0xc8] sm:$0xff]  ;;  %v1601_v9 = vld [vmem:[#allocation7 + $0x40] sm:$0xff]  ;;  %v2811_v22 = vpack.c.bf16 %v1614_v30, %v1611_v58  ;;  %s1589_s23 = scalar_lea.vmem [#allocation2], %s2126_s21  ;;  %vm2008_vm4 = vcmask (%p1578_p7), 130048   ;;  %vm2089_vm5 = vcmask (%p1578_p7), 7168  }
 0x251   : > { %v2830_v12 = vpack.c.bf16 %v1598_v35, %v1595_v52  ;;  %v1604_v10 = vld [vmem:[#allocation7 + $0x58] sm:$0xff]  ;;  %v1617_v16 = vld [vmem:[#allocation7 + $0xc0] sm:$0xff]  ;;  %v2813_v26 = vpack.c.bf16 %v1621_v53, %v1618_v51  ;;  %v1607_v46 = vld [vmem:[#allocation7 + $0x70] sm:$0xff] }
 0x252   : > { %2804 = vmatpush1.bf16.msra.mxu0 %v2803_v23  ;;  %v2833_v40 = vpack.c.bf16 %v1604_v10, %v1601_v9  ;;  %v1620_v49 = vld [vmem:[#allocation7 + $0xd8] sm:$0xff]  ;;  %v1610_v33 = vld [vmem:[#allocation7 + $0x88] sm:$0xff]  ;;  %v1627_v54 = vld [vmem:[#allocation7 + $0x110] sm:$0xff] }
 0x253   : > { %2806 = vmatprep.subr.bf16.mxu0 %v2805_v44  ;;  %2831 = vmatpush3.bf16.msra.mxu1 %v2830_v12  ;;  %v1624_v31 = vld [vmem:[#allocation7 + $0xf8] sm:$0xff]  ;;  %v2815_v2 = vpack.c.bf16 %v1620_v49, %v1617_v16  ;;  %v1623_v13 = vld [vmem:[#allocation7 + $0xf0] sm:$0xff]  ;;  %v2836_v55 = vpack.c.bf16 %v1610_v33, %v1607_v46  ;;  %v1626_v20 = vld [vmem:[#allocation7 + $0x108] sm:$0xff]  ;;  %v1807_v16 = vstv %s1806_s24 }
 0x254   : > { %2832 = vmatprep.subr.bf16.mxu1 %v3199_v15  ;;  %v2817_v45 = vpack.c.bf16 %v1627_v54, %v1624_v31  ;;  %v1613_v42 = vld [vmem:[#allocation7 + $0xa0] sm:$0xff]  ;;  %v1616_v60 = vld [vmem:[#allocation7 + $0xb8] sm:$0xff]  ;;  %v1630_v61 = vld [vmem:[#allocation7 + $0x128] sm:$0xff]  ;;  %v2819_v5 = vpack.c.bf16 %v1626_v20, %v1623_v13  ;;  %vm1808_vm1 = vcmp.eq.s32.totalorder %v1807_v16, 1  ;;  %v3202_v13 = vmov (%p1578_p7), 0.0|0.0  }
 0x255   : > { %v1633_v36 = vld [vmem:[#allocation7 + $0x140] sm:$0xff]  ;;  %v2839_v7 = vpack.c.bf16 %v1616_v60, %v1613_v42  ;;  %v1632_v8 = vld [vmem:[#allocation7 + $0x138] sm:$0xff]  ;;  %v1619_v24 = vld [vmem:[#allocation7 + $0xd0] sm:$0xff] }
 0x256   : > { %2808 = vmatpush1.bf16.msra.mxu0 %v2807_v0  ;;  %v1629_v59 = vld [vmem:[#allocation7 + $0x120] sm:$0xff]  ;;  %v2821_v43 = vpack.c.bf16 %v1633_v36, %v1630_v61  ;;  %v1622_v6 = vld [vmem:[#allocation7 + $0xe8] sm:$0xff]  ;;  %v1636_v21 = vld [vmem:[#allocation7 + $0x158] sm:$0xff] }
 0x257   : > { %2810 = vmatprep.subr.bf16.mxu0 %v2809_v34  ;;  %2834 = vmatpush3.bf16.msra.mxu1 %v2833_v40  ;;  %v1639_v39 = vld [vmem:[#allocation7 + $0x170] sm:$0xff]  ;;  %v2823_v3 = vpack.c.bf16 %v1632_v8, %v1629_v59  ;;  %v2842_v18 = vpack.c.bf16 %v1622_v6, %v1619_v24  ;;  %v1638_v48 = vld [vmem:[#allocation7 + $0x168] sm:$0xff]  ;;  %v1625_v11 = vld [vmem:[#allocation7 + $0x100] sm:$0xff] }
 0x258   : > { %2835 = vmatprep.subr.bf16.mxu1 %v3199_v15  ;;  %v1635_v63 = vld [vmem:[#allocation7 + $0x150] sm:$0xff]  ;;  %v2825_v19 = vpack.c.bf16 %v1639_v39, %v1636_v21  ;;  %v1628_v47 = vld [vmem:[#allocation7 + $0x118] sm:$0xff]  ;;  %v1634_v37 = vld [vmem:[#allocation7 + $0x148] sm:$0xff] }
 0x259   : > { %v2827_v62 = vpack.c.bf16 %v1638_v48, %v1635_v63  ;;  %v2845_v29 = vpack.c.bf16 %v1628_v47, %v1625_v11  ;;  %v1631_v4 = vld [vmem:[#allocation7 + $0x130] sm:$0xff]  ;;  %v1637_v50 = vld [vmem:[#allocation7 + $0x160] sm:$0xff]  ;;  %v1640_v32 = vld [vmem:[#allocation7 + $0x178] sm:$0xff] }
 0x25a   : > { %2812 = vmatpush1.bf16.msra.mxu0 %v2811_v22  ;;  %v2848_v28 = vpack.c.bf16 %v1634_v37, %v1631_v4  ;;  %v2851_v14 = vpack.c.bf16 %v1640_v32, %v1637_v50  ;;  %v1590_v41 = vld [vmem:[%s1589_s23] sm:$0xff]  ;;  %v1591_v38 = vld [vmem:[%s1589_s23 + $0x8] sm:$0xff]  ;;  %v1592_v12 = vld [vmem:[%s1589_s23 + $0x10] sm:$0xff] }
 0x25b   : > { %2814 = vmatprep.subr.bf16.mxu0 %v2813_v26  ;;  %2837 = vmatpush3.bf16.msra.mxu1 %v2836_v55  ;;  %v1815_v54 = vld [vmem:[%s4246_s5] sm:$0xff] (%p1578_p7)  ;;  %v1820_v42 = vld [vmem:[%s4246_s5 + $0x28] sm:$0xff] (%p1578_p7)  ;;  %v1912_v59 = vld [vmem:[%s4248_s7 + $0x18] sm:$0xff] (%p1578_p7) }
 0x25c   : > { %2838 = vmatprep.subr.bf16.mxu1 %v3199_v15  ;;  %v1819_v20 = vld [vmem:[%s4246_s5 + $0x20] sm:$0xff] (%p1578_p7)  ;;  %v1910_v61 = vld [vmem:[%s4248_s7 + $0x8] sm:$0xff] (%p1578_p7)  ;;  %v1822_v8 = vld [vmem:[%s4246_s5 + $0x38] sm:$0xff] (%p1578_p7) }
 0x25d   :  { %v1909_v60 = vld [vmem:[%s4248_s7] sm:$0xff] (%p1578_p7)  ;;  %v1914_v21 = vld [vmem:[%s4248_s7 + $0x28] sm:$0xff] (%p1578_p7)  ;;  %v1825_v48 = vld [vmem:[%s4246_s5 + $0x50] sm:$0xff] (%p1578_p7) }
 0x25e   : > { %2816 = vmatpush1.bf16.msra.mxu0 %v2815_v2  ;;  %v1816_v2 = vld [vmem:[%s4246_s5 + $0x8] sm:$0xff] (%p1578_p7)  ;;  %v2878_v36 = vpack.c.bf16 (%p1578_p7), %v1910_v61, %v1909_v60  ;;  %v1913_v6 = vld [vmem:[%s4248_s7 + $0x20] sm:$0xff] (%p1578_p7)  ;;  %v1826_v11 = vld [vmem:[%s4246_s5 + $0x58] sm:$0xff] (%p1578_p7) }
 0x25f   : > { %2818 = vmatprep.subr.bf16.mxu0 %v2817_v45  ;;  %2840 = vmatpush3.bf16.msra.mxu1 %v2839_v7  ;;  %v2854_v55 = vpack.c.bf16 (%p1578_p7), %v1816_v2, %v1815_v54  ;;  %v1818_v45 = vld [vmem:[%s4246_s5 + $0x18] sm:$0xff] (%p1578_p7)  ;;  %v2860_v7 = vpack.c.bf16 (%p1578_p7), %v1820_v42, %v1819_v20  ;;  %v1824_v63 = vld [vmem:[%s4246_s5 + $0x48] sm:$0xff] (%p1578_p7)  ;;  %v2869_v47 = vpack.c.bf16 (%p1578_p7), %v1826_v11, %v1825_v48  ;;  %v1829_v37 = vld [vmem:[%s4246_s5 + $0x70] sm:$0xff] (%p1578_p7) }
 0x260   : > { %2841 = vmatprep.subr.bf16.mxu1 %v3199_v15  ;;  %v1915_v32 = vld [vmem:[%s4248_s7 + $0x30] sm:$0xff] (%p1578_p7) }
 0x262   : > { %2820 = vmatpush1.bf16.msra.mxu0 %v2819_v5  ;;  %v1911_v5 = vld [vmem:[%s4248_s7 + $0x10] sm:$0xff] (%p1578_p7) }
 0x263   : > { %2822 = vmatprep.subr.bf16.mxu0 %v2821_v43  ;;  %2843 = vmatpush3.bf16.msra.mxu1 %v2842_v18  ;;  %v1821_v43 = vld [vmem:[%s4246_s5 + $0x30] sm:$0xff] (%p1578_p7)  ;;  %v2881_v24 = vpack.c.bf16 (%p1578_p7), %v1912_v59, %v1911_v5  ;;  %v2884_v18 = vpack.c.bf16 (%p1578_p7), %v1914_v21, %v1913_v6 }
 0x264   : > { %2844 = vmatprep.subr.bf16.mxu1 %v3199_v15  ;;  %v2863_v39 = vpack.c.bf16 (%p1578_p7), %v1822_v8, %v1821_v43 }
 0x266   : > { %2824 = vmatpush1.bf16.msra.mxu0 %v2823_v3  ;;  %v1823_v3 = vld [vmem:[%s4246_s5 + $0x40] sm:$0xff] (%p1578_p7) }
 0x267   : > { %2826 = vmatprep.subr.bf16.mxu0 %v2825_v19  ;;  %2846 = vmatpush3.bf16.msra.mxu1 %v2845_v29  ;;  %v2866_v19 = vpack.c.bf16 (%p1578_p7), %v1824_v63, %v1823_v3  ;;  %v1828_v29 = vld [vmem:[%s4246_s5 + $0x68] sm:$0xff] (%p1578_p7) }
 0x268   : > { %2847 = vmatprep.subr.bf16.mxu1 %v3199_v15 }
 0x26a   : > { %2828 = vmatpush1.bf16.msra.mxu0 %v2827_v62  ;;  %v1827_v62 = vld [vmem:[%s4246_s5 + $0x60] sm:$0xff] (%p1578_p7) }
 0x26b   : > { %2849 = vmatpush3.bf16.msra.mxu1 %v2848_v28  ;;  %2853 = vmatprep.subr.bf16.mxu0 (%p1578_p7), %v3202_v13  ;;  %v2872_v4 = vpack.c.bf16 (%p1578_p7), %v1828_v29, %v1827_v62  ;;  %v1830_v28 = vld [vmem:[%s4246_s5 + $0x78] sm:$0xff] (%p1578_p7) }
 0x26c   : > { %2850 = vmatprep.subr.bf16.mxu1 %v3199_v15  ;;  %v2875_v50 = vpack.c.bf16 (%p1578_p7), %v1830_v28, %v1829_v37 }
 0x26d   : > { %1706 = vmatmul.mubr.f32.vlgmr.msra.gmra.mrb[0].mxu0 %v3183_v27 }
 0x26e   :  { %2480 = vmatprep.mubr.msk.f32.mxu0 (%p1578_p7), %vm3203_vm2, %v3198_v17  ;;  %2855 = vmatpush3.bf16.msra.mxu0 (%p1578_p7), %v2854_v55 }
 0x26f   : > { %2852 = vmatpush3.bf16.msra.mxu1 %v2851_v14  ;;  %2856 = vmatprep.subr.bf16.mxu0 (%p1578_p7), %v3202_v13  ;;  %v1916_v14 = vld [vmem:[%s4248_s7 + $0x38] sm:$0xff] (%p1578_p7) }
 0x270   :  { %2877 = vmatprep.subr.bf16.mxu1 (%p1578_p7), %v3202_v13 }
 0x272   : > { %2446 = vmatmul.mubr.f32.vlgmr.msra.gmra.mrb[0].mxu1 %v3183_v27 }
 0x273   :  { %2499 = vmatprep.mubr.msk.f32.mxu1 (%p1578_p7), %vm3203_vm2, %v3198_v17  ;;  %2879 = vmatpush3.bf16.msra.mxu1 (%p1578_p7), %v2878_v36 }
 0x274   :  { %2880 = vmatprep.subr.bf16.mxu1 (%p1578_p7), %v3202_v13 }
 0x277   :  { %2882 = vmatpush3.bf16.msra.mxu1 (%p1578_p7), %v2881_v24 }
 0x278   :  { %2883 = vmatprep.subr.bf16.mxu1 (%p1578_p7), %v3202_v13 }
 0x27b   :  { %2885 = vmatpush3.bf16.msra.mxu1 (%p1578_p7), %v2884_v18 }
 0x27c   :  { %2886 = vmatprep.subr.bf16.mxu1 (%p1578_p7), %v3202_v13 }
 0x340   : > { %v1707_v23 = vpop.f32.mrb[0].mxu0 }
 0x341   : > { %v1782_v44 = vadd.f32 %v1707_v23, %v1590_v41  ;;  %v1709_v56 = vpop.f32.mrb[1].mxu0  ;;  %v2887_v41 = vpack.c.bf16 (%p1578_p7), %v1916_v14, %v1915_v32  ;;  %v2120_v23 = vld [vmem:[#allocation12] ss:$0 sm:$0xff] (%p1578_p7) }
 0x342   : > { %v1783_v25 = vadd.f32 %v1709_v56, %v1591_v38 }
 0x343   : > { %v2118_v57 = vmul.f32 -1.442695, %v1782_v44  ;;  %2888 = vmatpush3.bf16.msra.mxu1 (%p1578_p7), %v2887_v41 }
 0x344   : > { %v2119_v0 = vmul.f32 -1.442695, %v1783_v25  ;;  %2889 = vmatprep.subr.bf16.mxu1 (%p1578_p7), %v3202_v13  ;;  %v1999_v25 = vld [vmem:[%s4250_s9] sm:$0xff] (%p1578_p7) }
 0x345   : > { %3019 = vpow2.f32 %v2118_v57  ;;  %v1778_v58 = vpop.f32.mrb[0].mxu1 }
 0x346   : > { %v2447_v34 = vpop.f32.mrb[1].mxu1  ;;  %3021 = vpow2.f32 %v2119_v0  ;;  %v1796_v51 = vadd.f32 %v3353_v1, %v1778_v58  ;;  %v2000_v0 = vld [vmem:[%s4250_s9 + $0x8] sm:$0xff] (%p1578_p7) }
 0x347   :  { %v2890_v58 = vpack.c.bf16 (%p1578_p7), %v2000_v0, %v1999_v25  ;;  %v2121_v34 = vld [vmem:[#allocation13] ss:$0 sm:$0xff] (%p1578_p7) }
 0x34f   : > { %v3020_v15 = vpop.eup %3019 }
 0x350   : > { %v1790_v30 = vadd.f32 1.0, %v3020_v15  ;;  %v3022_v52 = vpop.eup %3021 }
 0x351   : > { %v1791_v35 = vadd.f32 1.0, %v3022_v52 }
 0x352   : > { %3023 = vrcp.f32 %v1790_v30 }
 0x353   : > { %3025 = vrcp.f32 %v1791_v35 }
 0x35c   : > { %v3024_v53 = vpop.eup %3023 }
 0x35d   : > { %v1797_v9 = vmul.f32 %v3024_v53, %v1796_v51  ;;  %v3026_v22 = vpop.eup %3025  ;;  %v2123_v51 = vld [vmem:[#allocation4] ss:$0 sm:$0xff] (%p1578_p7) }
 0x35e   : > { %v1800_v40 = vsub.f32 1.0, %v3026_v22  ;;  %v1802_v49 = vmul.f32 %v3183_v27, %v3026_v22 }
 0x35f   : > { %v1798_v10 = vadd.f32 %v1797_v9, %v1592_v12 }
 0x361   : > { %3027 = vtanh.f32 %v1798_v10 }
 0x36b   : > { %v3028_v26 = vpop.eup %3027 }
 0x36c   : > { %v1801_v46 = vmul.f32 %v3028_v26, %v1800_v40  ;;  %1580 = sbr.rel (!%p1578_p7) target bundleno = 586 (0x24a), region = 107 }
 0x36e   : > { %v1803_v33 = vadd.f32 %v1802_v49, %v1801_v46 }
 0x370   : > { %v4145_v27 = vsel %vm1808_vm1, %v1803_v33, %v3183_v27  }
 0x371   : > { %v4253_v31 = vmov %v4145_v27 }
 0x372   : > { %v4254_v27 = vmov %v4253_v31 }
 0x373   :  { %v1817_v27 = vld [vmem:[%s4246_s5 + $0x10] sm:$0xff] }
 0x374   :  { %v2857_v1 = vpack.c.bf16 %v1818_v45, %v1817_v27 }
 0x376   :  { %2858 = vmatpush3.bf16.msra.mxu0 %v2857_v1 }
 0x377   :  { %2859 = vmatprep.subr.bf16.mxu0 %v3202_v13 }
 0x37a   :  { %2861 = vmatpush3.bf16.msra.mxu0 %v2860_v7 }
 0x37b   :  { %2862 = vmatprep.subr.bf16.mxu0 %v3202_v13 }
 0x37e   :  { %2864 = vmatpush3.bf16.msra.mxu0 %v2863_v39 }
 0x37f   :  { %2865 = vmatprep.subr.bf16.mxu0 %v3202_v13 }
 0x382   :  { %2867 = vmatpush3.bf16.msra.mxu0 %v2866_v19 }
 0x383   :  { %2868 = vmatprep.subr.bf16.mxu0 %v3202_v13 }
 0x386   :  { %2870 = vmatpush3.bf16.msra.mxu0 %v2869_v47 }
 0x387   :  { %2871 = vmatprep.subr.bf16.mxu0 %v3202_v13 }
 0x38a   :  { %2873 = vmatpush3.bf16.msra.mxu0 %v2872_v4 }
 0x38b   :  { %2874 = vmatprep.subr.bf16.mxu0 %v3202_v13 }
 0x38e   :  { %2876 = vmatpush3.bf16.msra.mxu0 %v2875_v50 }
 0x391   :  { %2481 = vmatmul.mubr.f32.vlgmr.msra.gmra.mrb[0].mxu0 %v4253_v31 }
 0x464   :  { %v1904_v44 = vpop.f32.mrb[0].mxu0 }
 0x465   :  { %v1905_v38 = vadd.f32 %v2120_v23, %v1904_v44  ;;  %v2482_v56 = vpop.f32.mrb[1].mxu0 }
 0x467   :  { %v1908_v57 = vmax.f32 %v1905_v38, 0.0 }
 0x469   :  { %2500 = vmatmul.mubr.msk.f32.vlgmr.msra.gmra.mrb[0].mxu1 %vm1924_vm3, %v1908_v57 }
 0x46a   :  { %2506 = vmatprep.mubr.msk.f32.mxu1 %vm3203_vm2, %v3198_v17  ;;  %2891 = vmatpush3.bf16.msra.mxu1 %v2890_v58 }
 0x53c   :  { %v1994_v15 = vpop.f32.mrb[0].mxu1 }
 0x53d   :  { %v1995_v30 = vadd.f32 %v2121_v34, %v1994_v15  ;;  %v2501_v52 = vpop.f32.mrb[1].mxu1 }
 0x53f   :  { %v1998_v35 = vmax.f32 %v1995_v30, 0.0 }
 0x541   :  { %2507 = vmatmul.mubr.msk.f32.vlgmr.msra.gmra.mrb[2].mxu1 %vm2008_vm4, %v1998_v35 }
 0x614   :  { %v2078_v53 = vpop.f32.mrb[2].mxu1 }
 0x615   :  { %v2079_v17 = vadd.f32 %v2123_v51, %v2078_v53  ;;  %v2508_v12 = vpop.f32.mrb[3].mxu1 }
 0x617   :  { %v2125_v9 = vmul.f32 -1.442695, %v2079_v17 }
 0x619   :  { %3029 = vpow2.f32 %v2125_v9 }
 0x623   :  { %v3030_v10 = vpop.eup %3029 }
 0x624   :  { %v2085_v22 = vadd.f32 1.0, %v3030_v10 }
 0x626   :  { %3031 = vrcp.f32 %v2085_v22 }
 0x630   :  { %v3032_v16 = vpop.eup %3031 }
 0x631   :  { %v2088_v40 = vmul.f32 10.0, %v3032_v16 }
 0x633   :  { %2090 = vst.msk [vmem:[%s4252_s11] sm:$0xff] %vm2089_vm5, %v2088_v40 }
 0x634   :  { %2095 = vsyncpa [#allocation6], 1 }
 0x635   :  { %2096 = vsyncpa [#allocation8], 1 }
 0x636   :  { %2097 = vsyncpa [#allocation11], 1 }
 0x637   :  { %2098 = vsyncpa [#allocation14], 1 }

</bundles_post_ra>
